<compile_context>
chip_gen: v7x
topology: tpu7x:2x2x1
jax: 0.10.0
libtpu: 0.0.40
codegen_flags: <defaults>
</compile_context>

<pallas_src>
import math
from functools import partial

import jax
import jax.numpy as jnp
from jax.experimental import pallas as pl
from jax.experimental.pallas import tpu as pltpu


# ------------------------------ in-kernel helpers ------------------------------

def _layer_norm(x, w, b, eps):
    # x: (N, D) f32, w/b: (1, D) f32  -> (N, D) f32
    mean = jnp.mean(x, axis=-1, keepdims=True)
    var = jnp.mean(jnp.square(x - mean), axis=-1, keepdims=True)
    return (x - mean) * jax.lax.rsqrt(var + eps) * w + b


def _gelu_exact(x):
    # matches PyTorch F.gelu default (erf based)
    return 0.5 * x * (1.0 + jax.lax.erf(x / math.sqrt(2.0)))


def _softmax_last(s):
    # f32 softmax over the last axis; denominator reciprocal on the EUP slot,
    # one Newton step restores full f32 accuracy.
    s = s - jnp.max(s, axis=-1, keepdims=True)
    p = jnp.exp(s)
    den = jnp.sum(p, axis=-1, keepdims=True)
    r = pl.reciprocal(den, approx=True)
    r = r * (2.0 - den * r)
    return p * r


# ------------------------------- encoder kernel --------------------------------

def _encoder_kernel(emb_ref, kbias_ref,
                    ew_ref, eb_ref,
                    ln1w_ref, ln1b_ref,
                    wqkv_ref, bqkv_ref, wo_ref, bo_ref,
                    ln2w_ref, ln2b_ref,
                    f1w_ref, f1b_ref, f2w_ref, f2b_ref,
                    y_ref,
                    x_sc,
                    *, bt, seq, embed, heads, head_dim, layers, compute_dtype):
    l = pl.program_id(1)                      # layer axis ("arbitrary", innermost)
    n = bt * seq                              # packed token rows in this block

    def mm(a, b):
        # lane-dense matmul in compute_dtype, f32 accumulation on the MXU
        return jnp.dot(a.astype(compute_dtype), b.astype(compute_dtype),
                       preferred_element_type=jnp.float32)

    # ---- layer 0: embedding LayerNorm (eps=1e-6); dropout == identity ----
    @pl.when(l == 0)
    def _():
        e = emb_ref[...].reshape(n, embed)
        x_sc[...] = _layer_norm(e, ew_ref[...], eb_ref[...], 1e-6)

    x = x_sc[...]                             # (N, D) residual stream, f32
    kbias = kbias_ref[...]                    # (bt, 1, S) additive key-padding bias
    scale = 1.0 / math.sqrt(head_dim)

    # ---------------- self-attention block (pre-LN, eps=1e-5) ----------------
    h = _layer_norm(x, ln1w_ref[0], ln1b_ref[0], 1e-5)
    qkv = mm(h, wqkv_ref[0]) + bqkv_ref[0]    # one fused (N, 3D) projection
    heads_out = []
    for hh in range(heads):                   # static loop: only SxS score / PV math per head
        o0 = hh * head_dim
        qh = qkv[:, o0:o0 + head_dim].reshape(bt, seq, head_dim)
        kh = qkv[:, embed + o0:embed + o0 + head_dim].reshape(bt, seq, head_dim)
        vh = qkv[:, 2 * embed + o0:2 * embed + o0 + head_dim].reshape(bt, seq, head_dim)
        s = jnp.einsum('bqd,bkd->bqk',
                       qh.astype(compute_dtype), kh.astype(compute_dtype),
                       preferred_element_type=jnp.float32) * scale
        p = _softmax_last(s + kbias)                        # (bt, S, S) f32
        oh = jnp.einsum('bqk,bkd->bqd',
                        p.astype(compute_dtype), vh.astype(compute_dtype),
                        preferred_element_type=jnp.float32)
        heads_out.append(oh.reshape(n, head_dim))
    o = jnp.concatenate(heads_out, axis=-1)                 # (N, H*hd), lane-contiguous
    x = x + mm(o, wo_ref[0]) + bo_ref[0]                    # single (D, D) out-projection

    # ---------------- feed-forward block (pre-LN, eps=1e-5) ----------------
    h = _layer_norm(x, ln2w_ref[0], ln2b_ref[0], 1e-5)
    f = mm(h, f1w_ref[0]) + f1b_ref[0]
    f = _gelu_exact(f)
    f = mm(f, f2w_ref[0]) + f2b_ref[0]
    x = x + f

    x_sc[...] = x                             # carry activation to the next layer step

    # ---- last layer: hand the encoded activations back to HBM ----
    @pl.when(l == layers - 1)
    def _():
        y_ref[...] = x.reshape(bt, seq, embed).astype(y_ref.dtype)


# --------------------------- output-projection kernel --------------------------

def _logits_kernel(x_ref, w_ref, b_ref, o_ref, *, compute_dtype):
    o_ref[...] = (jnp.dot(x_ref[...].astype(compute_dtype),
                          w_ref[...].astype(compute_dtype),
                          preferred_element_type=jnp.float32)
                  + b_ref[...]).astype(o_ref.dtype)


def _pick_tile(dim, target, unit):
    """Largest divisor of `dim` <= target that is a multiple of `unit`
    (falls back to the full dim)."""
    if dim <= target:
        return dim
    for cand in range(target, unit - 1, -1):
        if dim % cand == 0 and cand % unit == 0:
            return cand
    return dim


def _output_projection(x2d, w, b, *, compute_dtype):
    ntok, d = x2d.shape
    v = w.shape[1]
    rt = _pick_tile(ntok, 512, 8)
    vt = _pick_tile(v, 2048, 128)
    return pl.pallas_call(
        partial(_logits_kernel, compute_dtype=compute_dtype),
        grid_spec=pltpu.PrefetchScalarGridSpec(
            num_scalar_prefetch=0,
            grid=(ntok // rt, v // vt),
            in_specs=[pl.BlockSpec((rt, d), lambda i, j: (i, 0)),
                      pl.BlockSpec((d, vt), lambda i, j: (0, j)),
                      pl.BlockSpec((1, vt), lambda i, j: (0, j))],
            out_specs=pl.BlockSpec((rt, vt), lambda i, j: (i, j))),
        out_shape=jax.ShapeDtypeStruct((ntok, v), jnp.float32),
        compiler_params=pltpu.CompilerParams(
            dimension_semantics=("parallel", "parallel")),
        cost_estimate=pl.CostEstimate(
            flops=int(2 * ntok * d * v),
            transcendentals=0,
            bytes_accessed=int(4 * ntok * (d + v)
                               + jnp.dtype(compute_dtype).itemsize * d * v)),
    )(x2d, w, b)


# --------------------------------- wrapper -------------------------------------

def _vmem_capacity_bytes():
    try:
        cap = getattr(pltpu.get_tpu_info(), 'vmem_capacity_bytes', None)
        if cap:
            return int(cap)
    except Exception:
        pass
    return 64 * 1024 * 1024        # conservative (v7x-sized) fallback


def lpbert_forward(params, day_ids, time_ids, location_ids, timedelta_ids,
                   attention_mask=None, *, config,
                   compute_dtype=jnp.float32, min_batch_tiles=1):
    D = config['embed_size']
    H = config['num_heads']
    hd = D // H
    L = config['num_layers']
    V = config['max_locations']
    Hid = config['hidden_size']

    # --- embedding table gathers are glue (plain XLA); everything else in-kernel ---
    emb = (params['day_emb'][day_ids] + params['time_emb'][time_ids]
           + params['loc_emb'][location_ids]
           + params['td_emb'][timedelta_ids]).astype(jnp.float32)
    B, S0, _ = emb.shape

    # --- key-padding mask, then pad S to a multiple of 8 (layout-free reshapes;
    #     padded keys masked out, padded query rows sliced off afterwards). ---
    if attention_mask is None:
        valid = jnp.ones((B, S0), jnp.float32)
    else:
        valid = (attention_mask != 0).astype(jnp.float32)
    pad = (-S0) % 8
    if pad:
        emb = jnp.pad(emb, ((0, 0), (0, pad), (0, 0)))
        valid = jnp.pad(valid, ((0, 0), (0, pad)))
    S = S0 + pad
    key_bias = jnp.where(valid == 0.0, jnp.float32(-1e30), jnp.float32(0.0))[:, None, :]

    # --- stream weight matrices in compute dtype (bf16 halves weight HBM traffic) ---
    wqkv = params['wqkv'].astype(compute_dtype)
    wo = params['wo'].astype(compute_dtype)
    f1w = params['ff1_w'].astype(compute_dtype)
    f2w = params['ff2_w'].astype(compute_dtype)

    wbytes = jnp.dtype(compute_dtype).itemsize
    per_layer_bytes = ((D * 3 * D + D * D + D * Hid + Hid * D) * wbytes
                       + (9 * D + Hid) * 4)             # f32 biases + LN params

    # --- generation-aware VMEM budget & batch-tile selection ---
    vmem_cap = _vmem_capacity_bytes()
    budget = int(0.80 * vmem_cap)

    def step_vmem_bytes(bt):
        n = bt * S
        return (2 * per_layer_bytes                     # double-buffered streamed weights
                + 4 * n * D                             # activation-carry scratch (f32)
                + 2 * 2 * 4 * bt * S * D                # emb in + encoded out blocks (x2 buffers)
                + 2 * 4 * bt * S                        # key-bias block
                + 4 * n * (3 * D + Hid + 4 * D)         # live f32 intermediates (qkv, ffn, x, o)
                + 4 * bt * S * S)                       # one head's attention probs

    bt = 1
    for cand in range(max(1, B // max(1, min_batch_tiles)), 0, -1):
        if B % cand == 0 and step_vmem_bytes(cand) <= budget:
            bt = cand
            break
    n_btiles = B // bt
    N = bt * S
    vmem_limit = int(min(max(budget, step_vmem_bytes(bt) + (4 << 20)), vmem_cap))

    def layer_spec(tail):
        zeros = (0,) * len(tail)
        return pl.BlockSpec((1,) + tuple(tail),
                            lambda b, l, _z=zeros: (l,) + _z)

    in_specs = [
        pl.BlockSpec((bt, S, D), lambda b, l: (b, 0, 0)),      # summed embeddings
        pl.BlockSpec((bt, 1, S), lambda b, l: (b, 0, 0)),      # key-padding bias
        pl.BlockSpec((1, D), lambda b, l: (0, 0)),             # emb LN weight
        pl.BlockSpec((1, D), lambda b, l: (0, 0)),             # emb LN bias
        layer_spec((1, D)),                                    # ln1 w  (streamed per layer)
        layer_spec((1, D)),                                    # ln1 b
        layer_spec((D, 3 * D)),                                # fused W_qkv
        layer_spec((1, 3 * D)),                                # fused b_qkv
        layer_spec((D, D)),                                    # W_out
        layer_spec((1, D)),                                    # b_out
        layer_spec((1, D)),                                    # ln2 w
        layer_spec((1, D)),                                    # ln2 b
        layer_spec((D, Hid)),                                  # FFN W1
        layer_spec((1, Hid)),                                  # FFN b1
        layer_spec((Hid, D)),                                  # FFN W2
        layer_spec((1, D)),                                    # FFN b2
    ]

    grid_spec = pltpu.PrefetchScalarGridSpec(
        num_scalar_prefetch=0,
        grid=(n_btiles, L),
        in_specs=in_specs,
        out_specs=pl.BlockSpec((bt, S, D), lambda b, l: (b, 0, 0)),
        scratch_shapes=[pltpu.VMEM((N, D), jnp.float32)],      # activation carry
    )

    flops = int(B * S * L * (8 * D * D + 4 * D * Hid) + 4 * B * L * S * S * D)
    transcendentals = int(B * S * L * (H * S + Hid))
    bytes_accessed = int(n_btiles * L * per_layer_bytes        # weights re-streamed per batch tile
                         + 4 * (2 * B * S * D + B * S + 2 * D))

    kernel = partial(_encoder_kernel, bt=bt, seq=S, embed=D, heads=H,
                     head_dim=hd, layers=L, compute_dtype=compute_dtype)

    encoded = pl.pallas_call(
        kernel,
        grid_spec=grid_spec,
        out_shape=jax.ShapeDtypeStruct((B, S, D), jnp.float32),
        compiler_params=pltpu.CompilerParams(
            dimension_semantics=("parallel", "arbitrary"),
            vmem_limit_bytes=vmem_limit),
        cost_estimate=pl.CostEstimate(flops=flops,
                                      transcendentals=transcendentals,
                                      bytes_accessed=bytes_accessed),
    )(emb, key_bias,
      params['emb_ln_w'], params['emb_ln_b'],
      params['ln1_w'], params['ln1_b'],
      wqkv, params['bqkv'], wo, params['bo'],
      params['ln2_w'], params['ln2_b'],
      f1w, params['ff1_b'], f2w, params['ff2_b'])

    if pad:
        encoded = encoded[:, :S0]

    logits = _output_projection(encoded.reshape(B * S0, D),
                                params['out_w'].astype(compute_dtype),
                                params['out_b'],
                                compute_dtype=compute_dtype)
    return logits.reshape(B, S0, V)


# ----------------------------- deterministic init ------------------------------

def init_params(key, config):
    D = config['embed_size']
    Hid = config['hidden_size']
    L = config['num_layers']
    V = config['max_locations']
    keys = jax.random.split(key, 8)

    def xavier(k, fan_out, fan_in):
        bound = math.sqrt(6.0 / (fan_in + fan_out))
        return jax.random.uniform(k, (fan_out, fan_in), jnp.float32, -bound, bound)

    p = {}
    # embeddings ~ N(0, 0.02)
    p['day_emb'] = 0.02 * jax.random.normal(keys[0], (config['max_days'], D), jnp.float32)
    p['time_emb'] = 0.02 * jax.random.normal(keys[1], (config['max_times'], D), jnp.float32)
    p['loc_emb'] = 0.02 * jax.random.normal(keys[2], (V, D), jnp.float32)
    p['td_emb'] = 0.02 * jax.random.normal(keys[3], (config['max_timedelta'], D), jnp.float32)
    p['emb_ln_w'] = jnp.ones((1, D), jnp.float32)
    p['emb_ln_b'] = jnp.zeros((1, D), jnp.float32)

    wqkv, wo, f1, f2 = [], [], [], []
    bqkv, bo, f1b, f2b = [], [], [], []
    lkeys = jax.random.split(keys[4], L * 8)
    for l in range(L):
        wqkv.append(xavier(lkeys[8 * l + 0], 3 * D, D).T)       # in_proj_weight.T -> (D, 3D)
        wo.append(xavier(lkeys[8 * l + 1], D, D).T)             # out_proj.weight.T -> (D, D)
        f1.append(xavier(lkeys[8 * l + 2], Hid, D).T)           # (D, Hid)
        f2.append(xavier(lkeys[8 * l + 3], D, Hid).T)           # (Hid, D)
        # PyTorch init zeros these biases; use small random values so the test
        # actually exercises the bias paths (ref uses the same params).
        bqkv.append(0.02 * jax.random.normal(lkeys[8 * l + 4], (1, 3 * D), jnp.float32))
        bo.append(0.02 * jax.random.normal(lkeys[8 * l + 5], (1, D), jnp.float32))
        f1b.append(0.02 * jax.random.normal(lkeys[8 * l + 6], (1, Hid), jnp.float32))
        f2b.append(0.02 * jax.random.normal(lkeys[8 * l + 7], (1, D), jnp.float32))

    p['wqkv'] = jnp.stack(wqkv)                                 # (L, D, 3D)
    p['bqkv'] = jnp.stack(bqkv)                                 # (L, 1, 3D)
    p['wo'] = jnp.stack(wo)                                     # (L, D, D)
    p['bo'] = jnp.stack(bo)                                     # (L, 1, D)
    p['ln1_w'] = jnp.ones((L, 1, D), jnp.float32)
    p['ln1_b'] = jnp.zeros((L, 1, D), jnp.float32)
    p['ln2_w'] = jnp.ones((L, 1, D), jnp.float32)
    p['ln2_b'] = jnp.zeros((L, 1, D), jnp.float32)
    p['ff1_w'] = jnp.stack(f1)                                  # (L, D, Hid)
    p['ff1_b'] = jnp.stack(f1b)                                 # (L, 1, Hid)
    p['ff2_w'] = jnp.stack(f2)                                  # (L, Hid, D)
    p['ff2_b'] = jnp.stack(f2b)                                 # (L, 1, D)
    p['out_w'] = xavier(keys[5], V, D).T                        # (D, V)
    p['out_b'] = jnp.zeros((1, V), jnp.float32)
    return p


# ----------------------------- pure-JAX reference ------------------------------

def ref_forward(params, day_ids, time_ids, location_ids, timedelta_ids,
                attention_mask=None, *, config):
    D = config['embed_size']
    H = config['num_heads']
    hd = D // H
    L = config['num_layers']
    x = (params['day_emb'][day_ids] + params['time_emb'][time_ids]
         + params['loc_emb'][location_ids] + params['td_emb'][timedelta_ids])
    B, S, _ = x.shape

    def ln(x, w, b, eps):
        m = jnp.mean(x, -1, keepdims=True)
        v = jnp.mean(jnp.square(x - m), -1, keepdims=True)
        return (x - m) * jax.lax.rsqrt(v + eps) * w + b

    x = ln(x, params['emb_ln_w'][0], params['emb_ln_b'][0], 1e-6)
    if attention_mask is None:
        key_bias = jnp.zeros((B, 1, 1, S), jnp.float32)
    else:
        key_bias = jnp.where(attention_mask == 0, -1e30, 0.0)[:, None, None, :]
    for l in range(L):
        h = ln(x, params['ln1_w'][l, 0], params['ln1_b'][l, 0], 1e-5)
        qkv = h @ params['wqkv'][l] + params['bqkv'][l, 0]
        q = qkv[..., :D].reshape(B, S, H, hd)
        k = qkv[..., D:2 * D].reshape(B, S, H, hd)
        v = qkv[..., 2 * D:].reshape(B, S, H, hd)
        s = jnp.einsum('bqhd,bkhd->bhqk', q, k) / math.sqrt(hd) + key_bias
        p = jax.nn.softmax(s, axis=-1)
        a = jnp.einsum('bhqk,bkhd->bqhd', p, v).reshape(B, S, D)
        x = x + a @ params['wo'][l] + params['bo'][l, 0]
        h = ln(x, params['ln2_w'][l, 0], params['ln2_b'][l, 0], 1e-5)
        f = h @ params['ff1_w'][l] + params['ff1_b'][l, 0]
        f = 0.5 * f * (1.0 + jax.lax.erf(f / math.sqrt(2.0)))
        f = f @ params['ff2_w'][l] + params['ff2_b'][l, 0]
        x = x + f
    return x @ params['out_w'] + params['out_b']


# ------------------------------------ main --------------------------------------

if __name__ == "__main__":
    config = dict(embed_size=32, hidden_size=64, num_layers=2, num_heads=4,
                  max_locations=128, max_days=8, max_times=48, max_timedelta=16,
                  dropout=0.1)

    key = jax.random.PRNGKey(0)
    pkey, dkey = jax.random.split(key)
    params = init_params(pkey, config)

    B, S = 2, 8
    k1, k2, k3, k4 = jax.random.split(dkey, 4)
    day_ids = jax.random.randint(k1, (B, S), 0, config['max_days'])
    time_ids = jax.random.randint(k2, (B, S), 0, config['max_times'])
    loc_ids = jax.random.randint(k3, (B, S), 0, config['max_locations'])
    td_ids = jax.random.randint(k4, (B, S), 0, config['max_timedelta'])

    # --- f32 path, no mask ---
    logits = jax.block_until_ready(
        lpbert_forward(params, day_ids, time_ids, loc_ids, td_ids, config=config))
    ref = ref_forward(params, day_ids, time_ids, loc_ids, td_ids, config=config)
    assert logits.shape == (B, S, config['max_locations'])
    err = float(jnp.max(jnp.abs(logits - ref)))
    assert jnp.allclose(logits, ref, atol=2e-3, rtol=2e-3), f"max abs err {err}"

    # --- f32 path, with key-padding mask (last two positions padded) ---
    attn_mask = jnp.ones((B, S), jnp.int32).at[:, S - 2:].set(0)
    logits_m = jax.block_until_ready(
        lpbert_forward(params, day_ids, time_ids, loc_ids, td_ids, attn_mask,
                       config=config))
    ref_m = ref_forward(params, day_ids, time_ids, loc_ids, td_ids, attn_mask,
                        config=config)
    err_m = float(jnp.max(jnp.abs(logits_m - ref_m)))
    assert jnp.allclose(logits_m, ref_m, atol=2e-3, rtol=2e-3), f"max abs err {err_m}"

    # --- bf16 compute path (production perf path): sanity-check only ---
    logits_bf = jax.block_until_ready(
        lpbert_forward(params, day_ids, time_ids, loc_ids, td_ids, config=config,
                       compute_dtype=jnp.bfloat16))
    err_bf = float(jnp.max(jnp.abs(logits_bf - ref)))
    assert jnp.isfinite(err_bf) and err_bf < 0.25, f"bf16 max abs err {err_bf}"

    print("KERNEL_OK")
</pallas_src>

<mosaic_0001>
module attributes {stable_mosaic.version = 11 : i64} {
  func.func @_encoder_kernel(%arg0: i32, %arg1: i32, %arg2: memref<2x8x32xf32, #tpu.memory_space<vmem>>, %arg3: memref<2x1x8xf32, #tpu.memory_space<vmem>>, %arg4: memref<1x32xf32, #tpu.memory_space<vmem>>, %arg5: memref<1x32xf32, #tpu.memory_space<vmem>>, %arg6: memref<1x1x32xf32, #tpu.memory_space<vmem>>, %arg7: memref<1x1x32xf32, #tpu.memory_space<vmem>>, %arg8: memref<1x32x96xf32, #tpu.memory_space<vmem>>, %arg9: memref<1x1x96xf32, #tpu.memory_space<vmem>>, %arg10: memref<1x32x32xf32, #tpu.memory_space<vmem>>, %arg11: memref<1x1x32xf32, #tpu.memory_space<vmem>>, %arg12: memref<1x1x32xf32, #tpu.memory_space<vmem>>, %arg13: memref<1x1x32xf32, #tpu.memory_space<vmem>>, %arg14: memref<1x32x64xf32, #tpu.memory_space<vmem>>, %arg15: memref<1x1x64xf32, #tpu.memory_space<vmem>>, %arg16: memref<1x64x32xf32, #tpu.memory_space<vmem>>, %arg17: memref<1x1x32xf32, #tpu.memory_space<vmem>>, %arg18: memref<2x8x32xf32, #tpu.memory_space<vmem>>, %arg19: memref<16x32xf32, #tpu.memory_space<vmem>>) attributes {dimension_semantics = [#tpu.dimension_semantics<parallel>, #tpu.dimension_semantics<arbitrary>], iteration_bounds = array<i64: 1, 2>, scalar_prefetch = 0 : i64, scratch_operands = 1 : i64, tpu.core_type = #tpu.core_type<tc>, window_params = [{transform_indices = @transform_0, window_bounds = array<i64: 2, 8, 32>}, {transform_indices = @transform_1, window_bounds = array<i64: 2, 1, 8>}, {pipeline_mode = #tpu.pipeline_mode<synchronous>, transform_indices = @transform_2, window_bounds = array<i64: 1, 32>}, {pipeline_mode = #tpu.pipeline_mode<synchronous>, transform_indices = @transform_3, window_bounds = array<i64: 1, 32>}, {transform_indices = @transform_4, window_bounds = array<i64: 1, 1, 32>}, {transform_indices = @transform_5, window_bounds = array<i64: 1, 1, 32>}, {transform_indices = @transform_6, window_bounds = array<i64: 1, 32, 96>}, {transform_indices = @transform_7, window_bounds = array<i64: 1, 1, 96>}, {transform_indices = @transform_8, window_bounds = array<i64: 1, 32, 32>}, {transform_indices = @transform_9, window_bounds = array<i64: 1, 1, 32>}, {transform_indices = @transform_10, window_bounds = array<i64: 1, 1, 32>}, {transform_indices = @transform_11, window_bounds = array<i64: 1, 1, 32>}, {transform_indices = @transform_12, window_bounds = array<i64: 1, 32, 64>}, {transform_indices = @transform_13, window_bounds = array<i64: 1, 1, 64>}, {transform_indices = @transform_14, window_bounds = array<i64: 1, 64, 32>}, {transform_indices = @transform_15, window_bounds = array<i64: 1, 1, 32>}, {transform_indices = @transform_16, window_bounds = array<i64: 2, 8, 32>}]} {
    %c0_i32 = arith.constant 0 : i32
    %0 = arith.cmpi eq, %arg1, %c0_i32 : i32
    %1 = arith.extui %0 : i1 to i32
    %c0_i32_0 = arith.constant 0 : i32
    %2 = arith.cmpi ne, %1, %c0_i32_0 : i32
    scf.if %2 {
      %c0_84 = arith.constant 0 : index
      %c0_85 = arith.constant 0 : index
      %c0_86 = arith.constant 0 : index
      %208 = vector.load %arg2[%c0_84, %c0_85, %c0_86] : memref<2x8x32xf32, #tpu.memory_space<vmem>>, vector<2x8x32xf32>
      %209 = vector.shape_cast %208 : vector<2x8x32xf32> to vector<16x32xf32>
      %c0_87 = arith.constant 0 : index
      %c0_88 = arith.constant 0 : index
      %210 = vector.load %arg4[%c0_87, %c0_88] : memref<1x32xf32, #tpu.memory_space<vmem>>, vector<1x32xf32>
      %c0_89 = arith.constant 0 : index
      %c0_90 = arith.constant 0 : index
      %211 = vector.load %arg5[%c0_89, %c0_90] : memref<1x32xf32, #tpu.memory_space<vmem>>, vector<1x32xf32>
      %cst_91 = arith.constant dense<0.000000e+00> : vector<16xf32>
      %212 = vector.multi_reduction <add>, %209, %cst_91 [1] : vector<16x32xf32> to vector<16xf32>
      %213 = vector.shape_cast %212 : vector<16xf32> to vector<16x1xf32>
      %cst_92 = arith.constant 3.200000e+01 : f32
      %214 = vector.broadcast %cst_92 : f32 to vector<16x1xf32>
      %215 = arith.divf %213, %214 : vector<16x1xf32>
      %216 = vector.broadcast %215 : vector<16x1xf32> to vector<16x32xf32>
      %217 = arith.subf %209, %216 : vector<16x32xf32>
      %218 = arith.mulf %217, %217 : vector<16x32xf32>
      %cst_93 = arith.constant dense<0.000000e+00> : vector<16xf32>
      %219 = vector.multi_reduction <add>, %218, %cst_93 [1] : vector<16x32xf32> to vector<16xf32>
      %220 = vector.shape_cast %219 : vector<16xf32> to vector<16x1xf32>
      %cst_94 = arith.constant 3.200000e+01 : f32
      %221 = vector.broadcast %cst_94 : f32 to vector<16x1xf32>
      %222 = arith.divf %220, %221 : vector<16x1xf32>
      %223 = vector.broadcast %215 : vector<16x1xf32> to vector<16x32xf32>
      %224 = arith.subf %209, %223 : vector<16x32xf32>
      %cst_95 = arith.constant 9.99999997E-7 : f32
      %225 = vector.broadcast %cst_95 : f32 to vector<16x1xf32>
      %226 = arith.addf %222, %225 : vector<16x1xf32>
      %227 = math.rsqrt %226 : vector<16x1xf32>
      %228 = vector.broadcast %227 : vector<16x1xf32> to vector<16x32xf32>
      %229 = arith.mulf %224, %228 : vector<16x32xf32>
      %230 = vector.broadcast %210 : vector<1x32xf32> to vector<16x32xf32>
      %231 = arith.mulf %229, %230 : vector<16x32xf32>
      %232 = vector.broadcast %211 : vector<1x32xf32> to vector<16x32xf32>
      %233 = arith.addf %231, %232 : vector<16x32xf32>
      %c0_96 = arith.constant 0 : index
      %c0_97 = arith.constant 0 : index
      %234 = vector.load %arg19[%c0_96, %c0_97] : memref<16x32xf32, #tpu.memory_space<vmem>>, vector<16x32xf32>
      tpu.vector_store %arg19[%c0_96, %c0_97], %233 {strides = array<i32>} : memref<16x32xf32, #tpu.memory_space<vmem>>, vector<16x32xf32>,
    } else {
    }
    %c0 = arith.constant 0 : index
    %c0_1 = arith.constant 0 : index
    %3 = vector.load %arg19[%c0, %c0_1] : memref<16x32xf32, #tpu.memory_space<vmem>>, vector<16x32xf32>
    %c0_2 = arith.constant 0 : index
    %c0_3 = arith.constant 0 : index
    %c0_4 = arith.constant 0 : index
    %4 = vector.load %arg3[%c0_2, %c0_3, %c0_4] : memref<2x1x8xf32, #tpu.memory_space<vmem>>, vector<2x1x8xf32>
    %c0_5 = arith.constant 0 : index
    %c0_6 = arith.constant 0 : index
    %c0_7 = arith.constant 0 : index
    %5 = vector.load %arg6[%c0_5, %c0_6, %c0_7] : memref<1x1x32xf32, #tpu.memory_space<vmem>>, vector<1x1x32xf32>
    %6 = vector.shape_cast %5 : vector<1x1x32xf32> to vector<1x32xf32>
    %c0_8 = arith.constant 0 : index
    %c0_9 = arith.constant 0 : index
    %c0_10 = arith.constant 0 : index
    %7 = vector.load %arg7[%c0_8, %c0_9, %c0_10] : memref<1x1x32xf32, #tpu.memory_space<vmem>>, vector<1x1x32xf32>
    %8 = vector.shape_cast %7 : vector<1x1x32xf32> to vector<1x32xf32>
    %cst = arith.constant dense<0.000000e+00> : vector<16xf32>
    %9 = vector.multi_reduction <add>, %3, %cst [1] : vector<16x32xf32> to vector<16xf32>
    %10 = vector.shape_cast %9 : vector<16xf32> to vector<16x1xf32>
    %cst_11 = arith.constant 3.200000e+01 : f32
    %11 = vector.broadcast %cst_11 : f32 to vector<16x1xf32>
    %12 = arith.divf %10, %11 : vector<16x1xf32>
    %13 = vector.broadcast %12 : vector<16x1xf32> to vector<16x32xf32>
    %14 = arith.subf %3, %13 : vector<16x32xf32>
    %15 = arith.mulf %14, %14 : vector<16x32xf32>
    %cst_12 = arith.constant dense<0.000000e+00> : vector<16xf32>
    %16 = vector.multi_reduction <add>, %15, %cst_12 [1] : vector<16x32xf32> to vector<16xf32>
    %17 = vector.shape_cast %16 : vector<16xf32> to vector<16x1xf32>
    %cst_13 = arith.constant 3.200000e+01 : f32
    %18 = vector.broadcast %cst_13 : f32 to vector<16x1xf32>
    %19 = arith.divf %17, %18 : vector<16x1xf32>
    %20 = vector.broadcast %12 : vector<16x1xf32> to vector<16x32xf32>
    %21 = arith.subf %3, %20 : vector<16x32xf32>
    %cst_14 = arith.constant 9.99999974E-6 : f32
    %22 = vector.broadcast %cst_14 : f32 to vector<16x1xf32>
    %23 = arith.addf %19, %22 : vector<16x1xf32>
    %24 = math.rsqrt %23 : vector<16x1xf32>
    %25 = vector.broadcast %24 : vector<16x1xf32> to vector<16x32xf32>
    %26 = arith.mulf %21, %25 : vector<16x32xf32>
    %27 = vector.broadcast %6 : vector<1x32xf32> to vector<16x32xf32>
    %28 = arith.mulf %26, %27 : vector<16x32xf32>
    %29 = vector.broadcast %8 : vector<1x32xf32> to vector<16x32xf32>
    %30 = arith.addf %28, %29 : vector<16x32xf32>
    %c0_15 = arith.constant 0 : index
    %c0_16 = arith.constant 0 : index
    %c0_17 = arith.constant 0 : index
    %31 = vector.load %arg8[%c0_15, %c0_16, %c0_17] : memref<1x32x96xf32, #tpu.memory_space<vmem>>, vector<1x32x96xf32>
    %32 = vector.shape_cast %31 : vector<1x32x96xf32> to vector<32x96xf32>
    %cst_18 = arith.constant dense<0.000000e+00> : vector<16x96xf32>
    %33 = tpu.matmul %30, %32, %cst_18 {dimension_numbers = #tpu.dot_dimension_numbers<[1], [0], [0], [1], [0, 0, 1, 1], [], []>} : vector<16x32xf32>, vector<32x96xf32>, vector<16x96xf32> -> vector<16x96xf32>
    %c0_19 = arith.constant 0 : index
    %c0_20 = arith.constant 0 : index
    %c0_21 = arith.constant 0 : index
    %34 = vector.load %arg9[%c0_19, %c0_20, %c0_21] : memref<1x1x96xf32, #tpu.memory_space<vmem>>, vector<1x1x96xf32>
    %35 = vector.shape_cast %34 : vector<1x1x96xf32> to vector<1x96xf32>
    %36 = vector.broadcast %35 : vector<1x96xf32> to vector<16x96xf32>
    %37 = arith.addf %33, %36 : vector<16x96xf32>
    %38 = vector.extract_strided_slice %37 {offsets = [0, 0], sizes = [16, 8], strides = [1, 1]} : vector<16x96xf32> to vector<16x8xf32>
    %39 = vector.shape_cast %38 : vector<16x8xf32> to vector<2x8x8xf32>
    %40 = vector.extract_strided_slice %37 {offsets = [0, 32], sizes = [16, 8], strides = [1, 1]} : vector<16x96xf32> to vector<16x8xf32>
    %41 = vector.shape_cast %40 : vector<16x8xf32> to vector<2x8x8xf32>
    %42 = vector.extract_strided_slice %37 {offsets = [0, 64], sizes = [16, 8], strides = [1, 1]} : vector<16x96xf32> to vector<16x8xf32>
    %43 = vector.shape_cast %42 : vector<16x8xf32> to vector<2x8x8xf32>
    "tpu.trace_start"() <{level = 10 : i32, message = "bqd,bkd->bqk"}> : () -> ()
    %cst_22 = arith.constant dense<0.000000e+00> : vector<2x8x8xf32>
    %44 = tpu.matmul %39, %41, %cst_22 {dimension_numbers = #tpu.dot_dimension_numbers<[2], [2], [1], [1], [0, 0, 0, 1, 1, 1], [0], [0]>} : vector<2x8x8xf32>, vector<2x8x8xf32>, vector<2x8x8xf32> -> vector<2x8x8xf32>
    "tpu.trace_stop"() : () -> ()
    %cst_23 = arith.constant 0.353553385 : f32
    %45 = vector.broadcast %cst_23 : f32 to vector<2x8x8xf32>
    %46 = arith.mulf %44, %45 : vector<2x8x8xf32>
    %47 = vector.broadcast %4 : vector<2x1x8xf32> to vector<2x8x8xf32>
    %48 = arith.addf %46, %47 : vector<2x8x8xf32>
    %cst_24 = arith.constant dense<0xFF800000> : vector<2x8xf32>
    %49 = vector.multi_reduction <maximumf>, %48, %cst_24 [2] : vector<2x8x8xf32> to vector<2x8xf32>
    %50 = vector.shape_cast %49 : vector<2x8xf32> to vector<2x8x1xf32>
    %51 = vector.broadcast %50 : vector<2x8x1xf32> to vector<2x8x8xf32>
    %52 = arith.subf %48, %51 : vector<2x8x8xf32>
    %53 = math.exp %52 : vector<2x8x8xf32>
    %cst_25 = arith.constant dense<0.000000e+00> : vector<2x8xf32>
    %54 = vector.multi_reduction <add>, %53, %cst_25 [2] : vector<2x8x8xf32> to vector<2x8xf32>
    %55 = vector.shape_cast %54 : vector<2x8xf32> to vector<2x8x1xf32>
    %56 = tpu.reciprocal %55 {approx = true} : vector<2x8x1xf32> -> vector<2x8x1xf32>
    %57 = arith.mulf %55, %56 : vector<2x8x1xf32>
    %cst_26 = arith.constant 2.000000e+00 : f32
    %58 = vector.broadcast %cst_26 : f32 to vector<2x8x1xf32>
    %59 = arith.subf %58, %57 : vector<2x8x1xf32>
    %60 = arith.mulf %56, %59 : vector<2x8x1xf32>
    %61 = vector.broadcast %60 : vector<2x8x1xf32> to vector<2x8x8xf32>
    %62 = arith.mulf %53, %61 : vector<2x8x8xf32>
    "tpu.trace_start"() <{level = 10 : i32, message = "bqk,bkd->bqd"}> : () -> ()
    %cst_27 = arith.constant dense<0.000000e+00> : vector<2x8x8xf32>
    %63 = tpu.matmul %62, %43, %cst_27 {dimension_numbers = #tpu.dot_dimension_numbers<[2], [1], [1], [2], [0, 0, 0, 1, 1, 2], [0], [0]>} : vector<2x8x8xf32>, vector<2x8x8xf32>, vector<2x8x8xf32> -> vector<2x8x8xf32>
    "tpu.trace_stop"() : () -> ()
    %64 = vector.shape_cast %63 : vector<2x8x8xf32> to vector<16x8xf32>
    %65 = vector.extract_strided_slice %37 {offsets = [0, 8], sizes = [16, 8], strides = [1, 1]} : vector<16x96xf32> to vector<16x8xf32>
    %66 = vector.shape_cast %65 : vector<16x8xf32> to vector<2x8x8xf32>
    %67 = vector.extract_strided_slice %37 {offsets = [0, 40], sizes = [16, 8], strides = [1, 1]} : vector<16x96xf32> to vector<16x8xf32>
    %68 = vector.shape_cast %67 : vector<16x8xf32> to vector<2x8x8xf32>
    %69 = vector.extract_strided_slice %37 {offsets = [0, 72], sizes = [16, 8], strides = [1, 1]} : vector<16x96xf32> to vector<16x8xf32>
    %70 = vector.shape_cast %69 : vector<16x8xf32> to vector<2x8x8xf32>
    "tpu.trace_start"() <{level = 10 : i32, message = "bqd,bkd->bqk"}> : () -> ()
    %cst_28 = arith.constant dense<0.000000e+00> : vector<2x8x8xf32>
    %71 = tpu.matmul %66, %68, %cst_28 {dimension_numbers = #tpu.dot_dimension_numbers<[2], [2], [1], [1], [0, 0, 0, 1, 1, 1], [0], [0]>} : vector<2x8x8xf32>, vector<2x8x8xf32>, vector<2x8x8xf32> -> vector<2x8x8xf32>
    "tpu.trace_stop"() : () -> ()
    %cst_29 = arith.constant 0.353553385 : f32
    %72 = vector.broadcast %cst_29 : f32 to vector<2x8x8xf32>
    %73 = arith.mulf %71, %72 : vector<2x8x8xf32>
    %74 = vector.broadcast %4 : vector<2x1x8xf32> to vector<2x8x8xf32>
    %75 = arith.addf %73, %74 : vector<2x8x8xf32>
    %cst_30 = arith.constant dense<0xFF800000> : vector<2x8xf32>
    %76 = vector.multi_reduction <maximumf>, %75, %cst_30 [2] : vector<2x8x8xf32> to vector<2x8xf32>
    %77 = vector.shape_cast %76 : vector<2x8xf32> to vector<2x8x1xf32>
    %78 = vector.broadcast %77 : vector<2x8x1xf32> to vector<2x8x8xf32>
    %79 = arith.subf %75, %78 : vector<2x8x8xf32>
    %80 = math.exp %79 : vector<2x8x8xf32>
    %cst_31 = arith.constant dense<0.000000e+00> : vector<2x8xf32>
    %81 = vector.multi_reduction <add>, %80, %cst_31 [2] : vector<2x8x8xf32> to vector<2x8xf32>
    %82 = vector.shape_cast %81 : vector<2x8xf32> to vector<2x8x1xf32>
    %83 = tpu.reciprocal %82 {approx = true} : vector<2x8x1xf32> -> vector<2x8x1xf32>
    %84 = arith.mulf %82, %83 : vector<2x8x1xf32>
    %cst_32 = arith.constant 2.000000e+00 : f32
    %85 = vector.broadcast %cst_32 : f32 to vector<2x8x1xf32>
    %86 = arith.subf %85, %84 : vector<2x8x1xf32>
    %87 = arith.mulf %83, %86 : vector<2x8x1xf32>
    %88 = vector.broadcast %87 : vector<2x8x1xf32> to vector<2x8x8xf32>
    %89 = arith.mulf %80, %88 : vector<2x8x8xf32>
    "tpu.trace_start"() <{level = 10 : i32, message = "bqk,bkd->bqd"}> : () -> ()
    %cst_33 = arith.constant dense<0.000000e+00> : vector<2x8x8xf32>
    %90 = tpu.matmul %89, %70, %cst_33 {dimension_numbers = #tpu.dot_dimension_numbers<[2], [1], [1], [2], [0, 0, 0, 1, 1, 2], [0], [0]>} : vector<2x8x8xf32>, vector<2x8x8xf32>, vector<2x8x8xf32> -> vector<2x8x8xf32>
    "tpu.trace_stop"() : () -> ()
    %91 = vector.shape_cast %90 : vector<2x8x8xf32> to vector<16x8xf32>
    %92 = vector.extract_strided_slice %37 {offsets = [0, 16], sizes = [16, 8], strides = [1, 1]} : vector<16x96xf32> to vector<16x8xf32>
    %93 = vector.shape_cast %92 : vector<16x8xf32> to vector<2x8x8xf32>
    %94 = vector.extract_strided_slice %37 {offsets = [0, 48], sizes = [16, 8], strides = [1, 1]} : vector<16x96xf32> to vector<16x8xf32>
    %95 = vector.shape_cast %94 : vector<16x8xf32> to vector<2x8x8xf32>
    %96 = vector.extract_strided_slice %37 {offsets = [0, 80], sizes = [16, 8], strides = [1, 1]} : vector<16x96xf32> to vector<16x8xf32>
    %97 = vector.shape_cast %96 : vector<16x8xf32> to vector<2x8x8xf32>
    "tpu.trace_start"() <{level = 10 : i32, message = "bqd,bkd->bqk"}> : () -> ()
    %cst_34 = arith.constant dense<0.000000e+00> : vector<2x8x8xf32>
    %98 = tpu.matmul %93, %95, %cst_34 {dimension_numbers = #tpu.dot_dimension_numbers<[2], [2], [1], [1], [0, 0, 0, 1, 1, 1], [0], [0]>} : vector<2x8x8xf32>, vector<2x8x8xf32>, vector<2x8x8xf32> -> vector<2x8x8xf32>
    "tpu.trace_stop"() : () -> ()
    %cst_35 = arith.constant 0.353553385 : f32
    %99 = vector.broadcast %cst_35 : f32 to vector<2x8x8xf32>
    %100 = arith.mulf %98, %99 : vector<2x8x8xf32>
    %101 = vector.broadcast %4 : vector<2x1x8xf32> to vector<2x8x8xf32>
    %102 = arith.addf %100, %101 : vector<2x8x8xf32>
    %cst_36 = arith.constant dense<0xFF800000> : vector<2x8xf32>
    %103 = vector.multi_reduction <maximumf>, %102, %cst_36 [2] : vector<2x8x8xf32> to vector<2x8xf32>
    %104 = vector.shape_cast %103 : vector<2x8xf32> to vector<2x8x1xf32>
    %105 = vector.broadcast %104 : vector<2x8x1xf32> to vector<2x8x8xf32>
    %106 = arith.subf %102, %105 : vector<2x8x8xf32>
    %107 = math.exp %106 : vector<2x8x8xf32>
    %cst_37 = arith.constant dense<0.000000e+00> : vector<2x8xf32>
    %108 = vector.multi_reduction <add>, %107, %cst_37 [2] : vector<2x8x8xf32> to vector<2x8xf32>
    %109 = vector.shape_cast %108 : vector<2x8xf32> to vector<2x8x1xf32>
    %110 = tpu.reciprocal %109 {approx = true} : vector<2x8x1xf32> -> vector<2x8x1xf32>
    %111 = arith.mulf %109, %110 : vector<2x8x1xf32>
    %cst_38 = arith.constant 2.000000e+00 : f32
    %112 = vector.broadcast %cst_38 : f32 to vector<2x8x1xf32>
    %113 = arith.subf %112, %111 : vector<2x8x1xf32>
    %114 = arith.mulf %110, %113 : vector<2x8x1xf32>
    %115 = vector.broadcast %114 : vector<2x8x1xf32> to vector<2x8x8xf32>
    %116 = arith.mulf %107, %115 : vector<2x8x8xf32>
    "tpu.trace_start"() <{level = 10 : i32, message = "bqk,bkd->bqd"}> : () -> ()
    %cst_39 = arith.constant dense<0.000000e+00> : vector<2x8x8xf32>
    %117 = tpu.matmul %116, %97, %cst_39 {dimension_numbers = #tpu.dot_dimension_numbers<[2], [1], [1], [2], [0, 0, 0, 1, 1, 2], [0], [0]>} : vector<2x8x8xf32>, vector<2x8x8xf32>, vector<2x8x8xf32> -> vector<2x8x8xf32>
    "tpu.trace_stop"() : () -> ()
    %118 = vector.shape_cast %117 : vector<2x8x8xf32> to vector<16x8xf32>
    %119 = vector.extract_strided_slice %37 {offsets = [0, 24], sizes = [16, 8], strides = [1, 1]} : vector<16x96xf32> to vector<16x8xf32>
    %120 = vector.shape_cast %119 : vector<16x8xf32> to vector<2x8x8xf32>
    %121 = vector.extract_strided_slice %37 {offsets = [0, 56], sizes = [16, 8], strides = [1, 1]} : vector<16x96xf32> to vector<16x8xf32>
    %122 = vector.shape_cast %121 : vector<16x8xf32> to vector<2x8x8xf32>
    %123 = vector.extract_strided_slice %37 {offsets = [0, 88], sizes = [16, 8], strides = [1, 1]} : vector<16x96xf32> to vector<16x8xf32>
    %124 = vector.shape_cast %123 : vector<16x8xf32> to vector<2x8x8xf32>
    "tpu.trace_start"() <{level = 10 : i32, message = "bqd,bkd->bqk"}> : () -> ()
    %cst_40 = arith.constant dense<0.000000e+00> : vector<2x8x8xf32>
    %125 = tpu.matmul %120, %122, %cst_40 {dimension_numbers = #tpu.dot_dimension_numbers<[2], [2], [1], [1], [0, 0, 0, 1, 1, 1], [0], [0]>} : vector<2x8x8xf32>, vector<2x8x8xf32>, vector<2x8x8xf32> -> vector<2x8x8xf32>
    "tpu.trace_stop"() : () -> ()
    %cst_41 = arith.constant 0.353553385 : f32
    %126 = vector.broadcast %cst_41 : f32 to vector<2x8x8xf32>
    %127 = arith.mulf %125, %126 : vector<2x8x8xf32>
    %128 = vector.broadcast %4 : vector<2x1x8xf32> to vector<2x8x8xf32>
    %129 = arith.addf %127, %128 : vector<2x8x8xf32>
    %cst_42 = arith.constant dense<0xFF800000> : vector<2x8xf32>
    %130 = vector.multi_reduction <maximumf>, %129, %cst_42 [2] : vector<2x8x8xf32> to vector<2x8xf32>
    %131 = vector.shape_cast %130 : vector<2x8xf32> to vector<2x8x1xf32>
    %132 = vector.broadcast %131 : vector<2x8x1xf32> to vector<2x8x8xf32>
    %133 = arith.subf %129, %132 : vector<2x8x8xf32>
    %134 = math.exp %133 : vector<2x8x8xf32>
    %cst_43 = arith.constant dense<0.000000e+00> : vector<2x8xf32>
    %135 = vector.multi_reduction <add>, %134, %cst_43 [2] : vector<2x8x8xf32> to vector<2x8xf32>
    %136 = vector.shape_cast %135 : vector<2x8xf32> to vector<2x8x1xf32>
    %137 = tpu.reciprocal %136 {approx = true} : vector<2x8x1xf32> -> vector<2x8x1xf32>
    %138 = arith.mulf %136, %137 : vector<2x8x1xf32>
    %cst_44 = arith.constant 2.000000e+00 : f32
    %139 = vector.broadcast %cst_44 : f32 to vector<2x8x1xf32>
    %140 = arith.subf %139, %138 : vector<2x8x1xf32>
    %141 = arith.mulf %137, %140 : vector<2x8x1xf32>
    %142 = vector.broadcast %141 : vector<2x8x1xf32> to vector<2x8x8xf32>
    %143 = arith.mulf %134, %142 : vector<2x8x8xf32>
    "tpu.trace_start"() <{level = 10 : i32, message = "bqk,bkd->bqd"}> : () -> ()
    %cst_45 = arith.constant dense<0.000000e+00> : vector<2x8x8xf32>
    %144 = tpu.matmul %143, %124, %cst_45 {dimension_numbers = #tpu.dot_dimension_numbers<[2], [1], [1], [2], [0, 0, 0, 1, 1, 2], [0], [0]>} : vector<2x8x8xf32>, vector<2x8x8xf32>, vector<2x8x8xf32> -> vector<2x8x8xf32>
    "tpu.trace_stop"() : () -> ()
    %145 = vector.shape_cast %144 : vector<2x8x8xf32> to vector<16x8xf32>
    %146 = tpu.concatenate %64, %91, %118, %145 in 1 : vector<16x8xf32>, vector<16x8xf32>, vector<16x8xf32>, vector<16x8xf32> -> vector<16x32xf32>
    %c0_46 = arith.constant 0 : index
    %c0_47 = arith.constant 0 : index
    %c0_48 = arith.constant 0 : index
    %147 = vector.load %arg10[%c0_46, %c0_47, %c0_48] : memref<1x32x32xf32, #tpu.memory_space<vmem>>, vector<1x32x32xf32>
    %148 = vector.shape_cast %147 : vector<1x32x32xf32> to vector<32x32xf32>
    %cst_49 = arith.constant dense<0.000000e+00> : vector<16x32xf32>
    %149 = tpu.matmul %146, %148, %cst_49 {dimension_numbers = #tpu.dot_dimension_numbers<[1], [0], [0], [1], [0, 0, 1, 1], [], []>} : vector<16x32xf32>, vector<32x32xf32>, vector<16x32xf32> -> vector<16x32xf32>
    %150 = arith.addf %3, %149 : vector<16x32xf32>
    %c0_50 = arith.constant 0 : index
    %c0_51 = arith.constant 0 : index
    %c0_52 = arith.constant 0 : index
    %151 = vector.load %arg11[%c0_50, %c0_51, %c0_52] : memref<1x1x32xf32, #tpu.memory_space<vmem>>, vector<1x1x32xf32>
    %152 = vector.shape_cast %151 : vector<1x1x32xf32> to vector<1x32xf32>
    %153 = vector.broadcast %152 : vector<1x32xf32> to vector<16x32xf32>
    %154 = arith.addf %150, %153 : vector<16x32xf32>
    %c0_53 = arith.constant 0 : index
    %c0_54 = arith.constant 0 : index
    %c0_55 = arith.constant 0 : index
    %155 = vector.load %arg12[%c0_53, %c0_54, %c0_55] : memref<1x1x32xf32, #tpu.memory_space<vmem>>, vector<1x1x32xf32>
    %156 = vector.shape_cast %155 : vector<1x1x32xf32> to vector<1x32xf32>
    %c0_56 = arith.constant 0 : index
    %c0_57 = arith.constant 0 : index
    %c0_58 = arith.constant 0 : index
    %157 = vector.load %arg13[%c0_56, %c0_57, %c0_58] : memref<1x1x32xf32, #tpu.memory_space<vmem>>, vector<1x1x32xf32>
    %158 = vector.shape_cast %157 : vector<1x1x32xf32> to vector<1x32xf32>
    %cst_59 = arith.constant dense<0.000000e+00> : vector<16xf32>
    %159 = vector.multi_reduction <add>, %154, %cst_59 [1] : vector<16x32xf32> to vector<16xf32>
    %160 = vector.shape_cast %159 : vector<16xf32> to vector<16x1xf32>
    %cst_60 = arith.constant 3.200000e+01 : f32
    %161 = vector.broadcast %cst_60 : f32 to vector<16x1xf32>
    %162 = arith.divf %160, %161 : vector<16x1xf32>
    %163 = vector.broadcast %162 : vector<16x1xf32> to vector<16x32xf32>
    %164 = arith.subf %154, %163 : vector<16x32xf32>
    %165 = arith.mulf %164, %164 : vector<16x32xf32>
    %cst_61 = arith.constant dense<0.000000e+00> : vector<16xf32>
    %166 = vector.multi_reduction <add>, %165, %cst_61 [1] : vector<16x32xf32> to vector<16xf32>
    %167 = vector.shape_cast %166 : vector<16xf32> to vector<16x1xf32>
    %cst_62 = arith.constant 3.200000e+01 : f32
    %168 = vector.broadcast %cst_62 : f32 to vector<16x1xf32>
    %169 = arith.divf %167, %168 : vector<16x1xf32>
    %170 = vector.broadcast %162 : vector<16x1xf32> to vector<16x32xf32>
    %171 = arith.subf %154, %170 : vector<16x32xf32>
    %cst_63 = arith.constant 9.99999974E-6 : f32
    %172 = vector.broadcast %cst_63 : f32 to vector<16x1xf32>
    %173 = arith.addf %169, %172 : vector<16x1xf32>
    %174 = math.rsqrt %173 : vector<16x1xf32>
    %175 = vector.broadcast %174 : vector<16x1xf32> to vector<16x32xf32>
    %176 = arith.mulf %171, %175 : vector<16x32xf32>
    %177 = vector.broadcast %156 : vector<1x32xf32> to vector<16x32xf32>
    %178 = arith.mulf %176, %177 : vector<16x32xf32>
    %179 = vector.broadcast %158 : vector<1x32xf32> to vector<16x32xf32>
    %180 = arith.addf %178, %179 : vector<16x32xf32>
    %c0_64 = arith.constant 0 : index
    %c0_65 = arith.constant 0 : index
    %c0_66 = arith.constant 0 : index
    %181 = vector.load %arg14[%c0_64, %c0_65, %c0_66] : memref<1x32x64xf32, #tpu.memory_space<vmem>>, vector<1x32x64xf32>
    %182 = vector.shape_cast %181 : vector<1x32x64xf32> to vector<32x64xf32>
    %cst_67 = arith.constant dense<0.000000e+00> : vector<16x64xf32>
    %183 = tpu.matmul %180, %182, %cst_67 {dimension_numbers = #tpu.dot_dimension_numbers<[1], [0], [0], [1], [0, 0, 1, 1], [], []>} : vector<16x32xf32>, vector<32x64xf32>, vector<16x64xf32> -> vector<16x64xf32>
    %c0_68 = arith.constant 0 : index
    %c0_69 = arith.constant 0 : index
    %c0_70 = arith.constant 0 : index
    %184 = vector.load %arg15[%c0_68, %c0_69, %c0_70] : memref<1x1x64xf32, #tpu.memory_space<vmem>>, vector<1x1x64xf32>
    %185 = vector.shape_cast %184 : vector<1x1x64xf32> to vector<1x64xf32>
    %186 = vector.broadcast %185 : vector<1x64xf32> to vector<16x64xf32>
    %187 = arith.addf %183, %186 : vector<16x64xf32>
    %cst_71 = arith.constant 5.000000e-01 : f32
    %188 = vector.broadcast %cst_71 : f32 to vector<16x64xf32>
    %189 = arith.mulf %188, %187 : vector<16x64xf32>
    %cst_72 = arith.constant 1.41421354 : f32
    %190 = vector.broadcast %cst_72 : f32 to vector<16x64xf32>
    %191 = arith.divf %187, %190 : vector<16x64xf32>
    %192 = math.erf %191 : vector<16x64xf32>
    %cst_73 = arith.constant 1.000000e+00 : f32
    %193 = vector.broadcast %cst_73 : f32 to vector<16x64xf32>
    %194 = arith.addf %193, %192 : vector<16x64xf32>
    %195 = arith.mulf %189, %194 : vector<16x64xf32>
    %c0_74 = arith.constant 0 : index
    %c0_75 = arith.constant 0 : index
    %c0_76 = arith.constant 0 : index
    %196 = vector.load %arg16[%c0_74, %c0_75, %c0_76] : memref<1x64x32xf32, #tpu.memory_space<vmem>>, vector<1x64x32xf32>
    %197 = vector.shape_cast %196 : vector<1x64x32xf32> to vector<64x32xf32>
    %cst_77 = arith.constant dense<0.000000e+00> : vector<16x32xf32>
    %198 = tpu.matmul %195, %197, %cst_77 {dimension_numbers = #tpu.dot_dimension_numbers<[1], [0], [0], [1], [0, 0, 1, 1], [], []>} : vector<16x64xf32>, vector<64x32xf32>, vector<16x32xf32> -> vector<16x32xf32>
    %c0_78 = arith.constant 0 : index
    %c0_79 = arith.constant 0 : index
    %c0_80 = arith.constant 0 : index
    %199 = vector.load %arg17[%c0_78, %c0_79, %c0_80] : memref<1x1x32xf32, #tpu.memory_space<vmem>>, vector<1x1x32xf32>
    %200 = vector.shape_cast %199 : vector<1x1x32xf32> to vector<1x32xf32>
    %201 = vector.broadcast %200 : vector<1x32xf32> to vector<16x32xf32>
    %202 = arith.addf %198, %201 : vector<16x32xf32>
    %203 = arith.addf %154, %202 : vector<16x32xf32>
    %c0_81 = arith.constant 0 : index
    %c0_82 = arith.constant 0 : index
    %204 = vector.load %arg19[%c0_81, %c0_82] : memref<16x32xf32, #tpu.memory_space<vmem>>, vector<16x32xf32>
    tpu.vector_store %arg19[%c0_81, %c0_82], %203 {strides = array<i32>} : memref<16x32xf32, #tpu.memory_space<vmem>>, vector<16x32xf32>,
    %c1_i32 = arith.constant 1 : i32
    %205 = arith.cmpi eq, %arg1, %c1_i32 : i32
    %206 = arith.extui %205 : i1 to i32
    %c0_i32_83 = arith.constant 0 : i32
    %207 = arith.cmpi ne, %206, %c0_i32_83 : i32
    scf.if %207 {
      %208 = vector.shape_cast %203 : vector<16x32xf32> to vector<2x8x32xf32>
      %c0_84 = arith.constant 0 : index
      %c0_85 = arith.constant 0 : index
      %c0_86 = arith.constant 0 : index
      %209 = vector.load %arg18[%c0_84, %c0_85, %c0_86] : memref<2x8x32xf32, #tpu.memory_space<vmem>>, vector<2x8x32xf32>
      tpu.vector_store %arg18[%c0_84, %c0_85, %c0_86], %208 {strides = array<i32>} : memref<2x8x32xf32, #tpu.memory_space<vmem>>, vector<2x8x32xf32>,
    } else {
    }
    return
  }
  func.func @transform_0(%arg0: i32, %arg1: i32) -> (i32, i32, i32) {
    %c0_i32 = arith.constant 0 : i32
    %c0_i32_0 = arith.constant 0 : i32
    %c0_i32_1 = arith.constant 0 : i32
    return %arg0, %c0_i32, %c0_i32_0 : i32, i32, i32
  }
  func.func @transform_1(%arg0: i32, %arg1: i32) -> (i32, i32, i32) {
    %c0_i32 = arith.constant 0 : i32
    %c0_i32_0 = arith.constant 0 : i32
    %c0_i32_1 = arith.constant 0 : i32
    return %arg0, %c0_i32, %c0_i32_0 : i32, i32, i32
  }
  func.func @transform_2(%arg0: i32, %arg1: i32) -> (i32, i32) {
    %c0_i32 = arith.constant 0 : i32
    %c0_i32_0 = arith.constant 0 : i32
    %c0_i32_1 = arith.constant 0 : i32
    return %c0_i32, %c0_i32_0 : i32, i32
  }
  func.func @transform_3(%arg0: i32, %arg1: i32) -> (i32, i32) {
    %c0_i32 = arith.constant 0 : i32
    %c0_i32_0 = arith.constant 0 : i32
    %c0_i32_1 = arith.constant 0 : i32
    return %c0_i32, %c0_i32_0 : i32, i32
  }
  func.func @transform_4(%arg0: i32, %arg1: i32) -> (i32, i32, i32) {
    %c0_i32 = arith.constant 0 : i32
    %c0_i32_0 = arith.constant 0 : i32
    %c0_i32_1 = arith.constant 0 : i32
    return %arg1, %c0_i32, %c0_i32_0 : i32, i32, i32
  }
  func.func @transform_5(%arg0: i32, %arg1: i32) -> (i32, i32, i32) {
    %c0_i32 = arith.constant 0 : i32
    %c0_i32_0 = arith.constant 0 : i32
    %c0_i32_1 = arith.constant 0 : i32
    return %arg1, %c0_i32, %c0_i32_0 : i32, i32, i32
  }
  func.func @transform_6(%arg0: i32, %arg1: i32) -> (i32, i32, i32) {
    %c0_i32 = arith.constant 0 : i32
    %c0_i32_0 = arith.constant 0 : i32
    %c0_i32_1 = arith.constant 0 : i32
    return %arg1, %c0_i32, %c0_i32_0 : i32, i32, i32
  }
  func.func @transform_7(%arg0: i32, %arg1: i32) -> (i32, i32, i32) {
    %c0_i32 = arith.constant 0 : i32
    %c0_i32_0 = arith.constant 0 : i32
    %c0_i32_1 = arith.constant 0 : i32
    return %arg1, %c0_i32, %c0_i32_0 : i32, i32, i32
  }
  func.func @transform_8(%arg0: i32, %arg1: i32) -> (i32, i32, i32) {
    %c0_i32 = arith.constant 0 : i32
    %c0_i32_0 = arith.constant 0 : i32
    %c0_i32_1 = arith.constant 0 : i32
    return %arg1, %c0_i32, %c0_i32_0 : i32, i32, i32
  }
  func.func @transform_9(%arg0: i32, %arg1: i32) -> (i32, i32, i32) {
    %c0_i32 = arith.constant 0 : i32
    %c0_i32_0 = arith.constant 0 : i32
    %c0_i32_1 = arith.constant 0 : i32
    return %arg1, %c0_i32, %c0_i32_0 : i32, i32, i32
  }
  func.func @transform_10(%arg0: i32, %arg1: i32) -> (i32, i32, i32) {
    %c0_i32 = arith.constant 0 : i32
    %c0_i32_0 = arith.constant 0 : i32
    %c0_i32_1 = arith.constant 0 : i32
    return %arg1, %c0_i32, %c0_i32_0 : i32, i32, i32
  }
  func.func @transform_11(%arg0: i32, %arg1: i32) -> (i32, i32, i32) {
    %c0_i32 = arith.constant 0 : i32
    %c0_i32_0 = arith.constant 0 : i32
    %c0_i32_1 = arith.constant 0 : i32
    return %arg1, %c0_i32, %c0_i32_0 : i32, i32, i32
  }
  func.func @transform_12(%arg0: i32, %arg1: i32) -> (i32, i32, i32) {
    %c0_i32 = arith.constant 0 : i32
    %c0_i32_0 = arith.constant 0 : i32
    %c0_i32_1 = arith.constant 0 : i32
    return %arg1, %c0_i32, %c0_i32_0 : i32, i32, i32
  }
  func.func @transform_13(%arg0: i32, %arg1: i32) -> (i32, i32, i32) {
    %c0_i32 = arith.constant 0 : i32
    %c0_i32_0 = arith.constant 0 : i32
    %c0_i32_1 = arith.constant 0 : i32
    return %arg1, %c0_i32, %c0_i32_0 : i32, i32, i32
  }
  func.func @transform_14(%arg0: i32, %arg1: i32) -> (i32, i32, i32) {
    %c0_i32 = arith.constant 0 : i32
    %c0_i32_0 = arith.constant 0 : i32
    %c0_i32_1 = arith.constant 0 : i32
    return %arg1, %c0_i32, %c0_i32_0 : i32, i32, i32
  }
  func.func @transform_15(%arg0: i32, %arg1: i32) -> (i32, i32, i32) {
    %c0_i32 = arith.constant 0 : i32
    %c0_i32_0 = arith.constant 0 : i32
    %c0_i32_1 = arith.constant 0 : i32
    return %arg1, %c0_i32, %c0_i32_0 : i32, i32, i32
  }
  func.func @transform_16(%arg0: i32, %arg1: i32) -> (i32, i32, i32) {
    %c0_i32 = arith.constant 0 : i32
    %c0_i32_0 = arith.constant 0 : i32
    %c0_i32_1 = arith.constant 0 : i32
    return %arg0, %c0_i32, %c0_i32_0 : i32, i32, i32
  }
}

</mosaic_0001>

<bundles_post_ra>
// kernel: tpu_custom_call.1
= control target key start
LH: loop header
LB: loop body
LE: loop exit
PB: predicated region body
PF: predicated region fallthrough
CT: control target
= control target key end

     0   :  { %s4092_s0 = inlined_call_operand.hbm [shape: f32[2,8,32], index: 0, kind: input, shape index: {}]   ;;  %s4093_s1 = inlined_call_operand.vmem [shape: f32[2,1,8], index: 1, kind: input, shape index: {}]   ;;  %s4094_s2 = inlined_call_operand.hbm [shape: f32[1,32], index: 2, kind: input, shape index: {}]   ;;  %s4095_s3 = inlined_call_operand.hbm [shape: f32[1,32], index: 3, kind: input, shape index: {}]   ;;  %s4096_s4 = inlined_call_operand.vmem [shape: f32[2,1,32], index: 4, kind: input, shape index: {}]   ;;  %s4097_s5 = inlined_call_operand.vmem [shape: f32[2,1,32], index: 5, kind: input, shape index: {}]   ;;  %s4098_s6 = inlined_call_operand.vmem [shape: f32[2,32,96], index: 6, kind: input, shape index: {}]   ;;  %s4099_s7 = inlined_call_operand.vmem [shape: f32[2,1,96], index: 7, kind: input, shape index: {}]   ;;  %s4100_s8 = inlined_call_operand.vmem [shape: f32[2,32,32], index: 8, kind: input, shape index: {}]   ;;  %s4101_s9 = inlined_call_operand.vmem [shape: f32[2,1,32], index: 9, kind: input, shape index: {}]   ;;  %s4102_s10 = inlined_call_operand.vmem [shape: f32[2,1,32], index: 10, kind: input, shape index: {}]   ;;  %s4103_s11 = inlined_call_operand.vmem [shape: f32[2,1,32], index: 11, kind: input, shape index: {}]   ;;  %s4104_s12 = inlined_call_operand.vmem [shape: f32[2,32,64], index: 12, kind: input, shape index: {}]   ;;  %s4105_s13 = inlined_call_operand.vmem [shape: f32[2,1,64], index: 13, kind: input, shape index: {}]   ;;  %s4106_s14 = inlined_call_operand.vmem [shape: f32[2,64,32], index: 14, kind: input, shape index: {}]   ;;  %s4107_s15 = inlined_call_operand.vmem [shape: f32[2,1,32], index: 15, kind: input, shape index: {}]   ;;  %s4108_s16 = inlined_call_operand.hbm [shape: f32[2,8,32], index: 16, kind: output, shape index: {}]  }
   0x1   :  { %4118 = sst [smem:[#allocation16_spill]] %s4092_s0 }
   0x2   :  { %4119 = sst [smem:[#allocation17_spill]] %s4093_s1 }
   0x3   :  { %4120 = sst [smem:[#allocation18_spill]] %s4094_s2 }
   0x4   :  { %4121 = sst [smem:[#allocation19_spill]] %s4095_s3 }
   0x5   :  { %4122 = sst [smem:[#allocation20_spill]] %s4098_s6 }
   0x6   :  { %4123 = sst [smem:[#allocation21_spill]] %s4100_s8 }
   0x7   :  { %4124 = sst [smem:[#allocation22_spill]] %s4106_s14 }
   0x8   :  { %4125 = sst [smem:[#allocation23_spill]] %s4107_s15 }
   0x9   :  { %4126 = sst [smem:[#allocation24_spill]] %s4108_s16 }
   0xa   :  { %21 = vsyncpa [#allocation4], 0 }
   0xb   :  { %22 = vsyncpa [#allocation7], 0 }
   0xc   :  { %23 = vsyncpa [#allocation5], 0  ;;  %s3618_s21 = smov 0   ;;  %s3620_s22 = smov 0  }
   0xd   :  { %s3622_s23 = smov 0  }
   0xe LB: > { %4127 = sst [smem:[#allocation13_spill]] %s3504_s22  ;;  %s3510_s24 = smov [#allocation6]   ;;  %s3508_s23 = sphi %s3622_s23, %s29_s23   ;;  %s3504_s22 = sphi %s3620_s22, %s4158_s22   ;;  %s3500_s21 = sphi %s3618_s21, %s4157_s21  }
   0xf   : > { %4128 = sst [smem:[#allocation14_spill]] %s3508_s23  ;;  %s515_s25 = sshll.u32 %s3510_s24, 4  ;;  %s516_s25 = int_to_ptr.vmem [resolvable:$true] %s515_s25 }
  0x10   : > { %s4110_s26 = sadd.s32 4294967295, %s3508_s23   ;;  %p2931_p0 = scmp.ge.s32.totalorder %s3508_s23, 1 }
  0x11   : > { %p478_p1 = scmp.lt.s32.totalorder %s3508_s23, 3  ;;  %p3638_p2 = scmp.eq.s32.totalorder %s4110_s26, 0 }
  0x12   : > { %s38_s29 = sadd.s32 1, %s3504_s22  ;;  %s3511_s17 = smov [#allocation3]  }
  0x13   : > { %s4129_s27 = scalar_select %p3638_p2, 1, 0 }
  0x14   : > { %p3642_p3 = pnand %p2931_p0, %p478_p1  ;;  %p3655_p6 = scmp.ge.s32.totalorder %s38_s29, 2 }
  0x15   : > { %s493_s18 = sshll.u32 %s3511_s17, 4  ;;  %s4133_s2 = sld [smem:[#allocation18_spill]]  ;;  %s3659_s18 = int_to_ptr.vmem [resolvable:$true] %s493_s18 }
  0x16   : > { %s4130_s28 = scalar_select %p3642_p3, 1, 0 }
  0x17   : > { %p3251_p4 = pneg %p3642_p3 }
  0x18   : > { %s4132_s0 = scalar_select %p3655_p6, 1, 0 }
  0x19   : > { %p3651_p5 = pnand %p3638_p2, %p3251_p4 }
  0x1b   : > { %s3364_s24 = scalar_lea.hbm %s4133_s2, 16  ;;  %p3669_p8 = pneg %p3651_p5 }
  0x1c   : > { %p3365_p7 = scmp.ne.s32.totalorder %s4133_s2, %s3364_s24  ;;  %p3371_p11 = scmp.lt.u32.totalorder %s3364_s24, %s4133_s2 }
  0x1e   : > { %p3367_p9 = pnand %p3669_p8, %p3365_p7 }
  0x20   : > { %p3368_p10 = pneg %p3367_p9 }
  0x22   : > { %p3373_p12 = pnand %p3371_p11, %p3368_p10 }
  0x24   : > { %3376 = shalt.err (!%p3373_p12)
}
  0x25   : > { %s3377_s19 = scalar_lea.vmem %s516_s25, 16  ;;  %s3384_s22 = scalar_lea.vmem %s516_s25, 32 }
  0x26   : > { %p3378_p13 = scmp.ne.s32.totalorder %s516_s25, %s3377_s19  ;;  %p3385_p4 = scmp.lt.s32.totalorder %s516_s25, %s516_s25 }
  0x27   : > { %p3386_p2 = scmp.lt.s32.totalorder %s3384_s22, %s3377_s19 }
  0x28   : > { %p3380_p0 = pnand %p3378_p13, %p3669_p8 }
  0x29   : > { %p3387_p3 = por %p3386_p2, %p3385_p4 }
  0x2a   : > { %p3381_p1 = pneg %p3380_p0 }
  0x2c   : > { %p3388_p6 = pnand %p3387_p3, %p3381_p1 }
  0x2e   : > { %3391 = shalt.err (!%p3388_p6)
}
  0x2f   : > { %3257 = dma.hbm_to_vmem [thread:$0]  (!%p3651_p5), %s4133_s2, 16, %s516_s25, [#allocation7]  }
  0x30   : > { %p4135_p7 = scmp.ne.s32.totalorder %s4132_s0, 0  ;;  %s4137_s17 = sld [smem:[#allocation16_spill]] }
  0x32   : > { %s4160_s29 = smov (%p4135_p7, %s38_s29), 0 }
  0x33   : > { %4136 = sst [smem:[#allocation15_spill]] %s4160_s29 }
  0x36   : > { %s3392_s1 = scalar_lea.hbm %s4137_s17, 256 }
  0x37   : > { %p3393_p2 = scmp.ne.s32.totalorder %s4137_s17, %s3392_s1  ;;  %p3399_p9 = scmp.lt.u32.totalorder %s3392_s1, %s4137_s17 }
  0x39   : > { %p3395_p3 = pnand %p3393_p2, %p3669_p8 }
  0x3b   : > { %p3396_p6 = pneg %p3395_p3 }
  0x3d   : > { %p3401_p10 = pnand %p3399_p9, %p3396_p6 }
  0x3f   : > { %3404 = shalt.err (!%p3401_p10)
}
  0x40   : > { %s3405_s25 = scalar_lea.vmem %s3659_s18, 256  ;;  %p3413_p0 = scmp.lt.s32.totalorder %s3659_s18, %s3659_s18 }
  0x41   : > { %p3406_p11 = scmp.ne.s32.totalorder %s3659_s18, %s3405_s25  ;;  %p3414_p1 = scmp.lt.s32.totalorder %s3405_s25, %s3405_s25 }
  0x43   : > { %p3408_p12 = pnand %p3406_p11, %p3669_p8  ;;  %p3415_p4 = por %p3414_p1, %p3413_p0 }
  0x45   : > { %p3409_p13 = pneg %p3408_p12 }
  0x47   : > { %p3416_p7 = pnand %p3415_p4, %p3409_p13 }
  0x49   : > { %3419 = shalt.err (!%p3416_p7)
}
  0x4a   : > { %s3512_s15 = smov 128   ;;  %s3513_s1 = smov 8  }
  0x4b   : > { %3254 = dma.hbm_to_vmem [thread:$0]  (!%p3651_p5), %s4137_s17, 256, %s3659_s18, [#allocation4], %s3512_s15, %s3512_s15, %s3513_s1  }
  0x4c   : > { %s3514_s26 = smov [#allocation8]   ;;  %s4138_s3 = sld [smem:[#allocation19_spill]] }
  0x4d   : > { %s526_s20 = sshll.u32 %s3514_s26, 4  ;;  %s527_s20 = int_to_ptr.vmem [resolvable:$true] %s526_s20 }
  0x52   : > { %s3420_s19 = scalar_lea.hbm %s4138_s3, 16 }
  0x53   : > { %p3421_p2 = scmp.ne.s32.totalorder %s4138_s3, %s3420_s19  ;;  %p3427_p9 = scmp.lt.u32.totalorder %s3420_s19, %s4138_s3 }
  0x55   : > { %p3423_p3 = pnand %p3421_p2, %p3669_p8 }
  0x57   : > { %p3424_p6 = pneg %p3423_p3 }
  0x59   : > { %p3429_p10 = pnand %p3427_p9, %p3424_p6 }
  0x5b   : > { %3432 = shalt.err (!%p3429_p10)
}
  0x5c   : > { %s3433_s18 = scalar_lea.vmem %s527_s20, 16  ;;  %s3440_s15 = scalar_lea.vmem %s527_s20, 32 }
  0x5d   : > { %p3434_p11 = scmp.ne.s32.totalorder %s527_s20, %s3433_s18  ;;  %p3441_p0 = scmp.lt.s32.totalorder %s527_s20, %s527_s20 }
  0x5e   : > { %p3442_p1 = scmp.lt.s32.totalorder %s3440_s15, %s3433_s18 }
  0x5f   : > { %p3436_p12 = pnand %p3434_p11, %p3669_p8 }
  0x60   : > { %p3443_p4 = por %p3442_p1, %p3441_p0 }
  0x61   : > { %p3437_p13 = pneg %p3436_p12 }
  0x63   : > { %p3444_p7 = pnand %p3443_p4, %p3437_p13 }
  0x65   : > { %3447 = shalt.err (!%p3444_p7)
}
  0x66   : > { %3260 = dma.hbm_to_vmem [thread:$0]  (!%p3651_p5), %s4138_s3, 16, %s527_s20, [#allocation7]  }
  0x67   : > { %p4139_p2 = scmp.ne.s32.totalorder %s4130_s28, 0 }
  0x68   : > { %p4140_p3 = scmp.ne.s32.totalorder (!%p4139_p2), %s4129_s27, 0 }
  0x69   : > { %619 = sbr.rel (%p4139_p2) target bundleno = 4600 (0x11f8), region = 84 }
  0x70   : > { %3487 = dma.done.wait (%p4140_p3), [#allocation4], 256  }
  0x71   : > { %3489 = vsyncadd (%p4140_p3), [#allocation4], 4294967040 }
  0x72   : > { %3491 = dma.done.wait (%p4140_p3), [#allocation7], 32  }
  0x73   : > { %3493 = vsyncadd (%p4140_p3), [#allocation7], 4294967264  ;;  %p721_p8 = scmp.lt.s32.totalorder %s3500_s21, 1  ;;  %s4141_s6 = sld [smem:[#allocation20_spill]] }
  0x74   : > { %s4142_s8 = sld [smem:[#allocation21_spill]]  ;;  %s4143_s28 = sld [smem:[#allocation22_spill]] }
  0x75   : > { %s3742_s2 = scalar_select %p721_p8, %s3500_s21, 1 }
  0x76   : > { %s4144_s0 = sld [smem:[#allocation23_spill]]  ;;  %p2949_p5 = scmp.ne.s32.totalorder %s3500_s21, 0 }
  0x77   : > { %s2999_s26 = sshll.u32 %s3742_s2, 5  ;;  %s748_s24 = scalar_lea.vmem %s4103_s11, %s3742_s2  ;;  %v770_v0 = vld [vmem:[#allocation3] sm:$0xff] (!%p2949_p5)  ;;  %vm774_vm0 = vcmask (!%p2949_p5), 261120   ;;  %v771_v1 = vld [vmem:[#allocation3 + $0x8] sm:$0xff] (!%p2949_p5)  ;;  %v2950_v21 = vld [vmem:[#allocation6] ss:$0 sm:$0xff] (!%p2949_p5) }
  0x78   : > { %s3782_s27 = scalar_lea.vmem %s4104_s12, %s2999_s26  ;;  %s756_s3 = scalar_lea.vmem %s4105_s13, %s3742_s2  ;;  %v775_v2 = vsel (!%p2949_p5), %vm774_vm0, %v770_v0, 0.0  ;;  %v778_v3 = vsel (!%p2949_p5), %vm774_vm0, %v771_v1, 0.0  ;;  %v2951_v23 = vld [vmem:[#allocation8] ss:$0 sm:$0xff] (!%p2949_p5) }
  0x79   : > { %s3760_s25 = scalar_lea.vmem %s4141_s6, %s2999_s26  ;;  %s3002_s6 = sshll.u32 %s3742_s2, 6  ;;  %776 = vadd.xlane.f32.xlu0 (!%p2949_p5), %v775_v2 }
  0x7a   : > { %s3765_s1 = scalar_lea.vmem %s4142_s8, %s2999_s26  ;;  %s3792_s8 = scalar_lea.vmem %s4143_s28, %s3002_s6 }
  0x7b   : > { %769 = sbr.rel (%p2949_p5) target bundleno = 438 (0x1b6), region = 100 }
  0x7c   : > { %s764_s20 = scalar_lea.vmem %s4144_s0, %s3742_s2 }
  0x7d   : > { %779 = vadd.xlane.f32.xlu0 (!%p2949_p5), %v778_v3 }
 0x106   : > { %v777_v4 = vpop.xlane.xlu0 %776 }
 0x107   : > { %v782_v5 = vmul.f32 0.03125, %v777_v4 }
 0x109   : > { %v784_v6 = vsub.f32 %v770_v0, %v782_v5 }
 0x10a   : > { %v780_v7 = vpop.xlane.xlu0 %779 }
 0x10b   : > { %v783_v8 = vmul.f32 0.03125, %v780_v7  ;;  %v786_v9 = vmul.f32 %v784_v6, %v784_v6 }
 0x10d   : > { %v785_v10 = vsub.f32 %v771_v1, %v783_v8  ;;  %v788_v11 = vsel %vm774_vm0, %v786_v9, 0.0 }
 0x10e   : > { %789 = vadd.xlane.f32.xlu1 %v788_v11 }
 0x10f   : > { %v787_v12 = vmul.f32 %v785_v10, %v785_v10 }
 0x111   : > { %v791_v13 = vsel %vm774_vm0, %v787_v12, 0.0 }
 0x112   : > { %792 = vadd.xlane.f32.xlu1 %v791_v13 }
 0x19b   : > { %v790_v14 = vpop.xlane.xlu1 %789 }
 0x19c   : > { %v794_v15 = vmul.f32 0.03125, %v790_v14 }
 0x19e   : > { %v796_v16 = vadd.f32 1e-06, %v794_v15 }
 0x19f   : > { %v793_v17 = vpop.xlane.xlu1 %792 }
 0x1a0   : > { %3316 = vrsqrt.f32 %v796_v16  ;;  %v795_v18 = vmul.f32 0.03125, %v793_v17 }
 0x1a2   : > { %v797_v19 = vadd.f32 1e-06, %v795_v18 }
 0x1a4   : > { %3318 = vrsqrt.f32 %v797_v19 }
 0x1aa   : > { %v3317_v20 = vpop.eup %3316 }
 0x1ab   : > { %v800_v22 = vmul.f32 %v3317_v20, %v784_v6 }
 0x1ad   : > { %v808_v24 = vmul.f32 %v2950_v21, %v800_v22 }
 0x1ae   : > { %v3319_v25 = vpop.eup %3318 }
 0x1af   : > { %v816_v26 = vadd.f32 %v2951_v23, %v808_v24  ;;  %v801_v27 = vmul.f32 %v3319_v25, %v785_v10 }
 0x1b1   : > { %818 = vst.msk [vmem:[#allocation2] sm:$0xff] %vm774_vm0, %v816_v26  ;;  %v809_v28 = vmul.f32 %v2950_v21, %v801_v27 }
 0x1b3   : > { %v817_v29 = vadd.f32 %v2951_v23, %v809_v28 }
 0x1b5   : > { %819 = vst.msk [vmem:[#allocation2 + $0x8] sm:$0xff] %vm774_vm0, %v817_v29 }
 0x1b6 PF: > { %vm826_vm1 = vcmask 261120   ;;  %v870_v44 = vld [vmem:[%s3760_s25] sm:$0xff]  ;;  %v871_v45 = vld [vmem:[%s3760_s25 + $0x8] sm:$0xff]  ;;  %v872_v46 = vld [vmem:[%s3760_s25 + $0x10] sm:$0xff]  ;;  %s4145_s26 = scalar_lea.vmem %s4096_s4, %s3742_s2  ;;  %s4146_s23 = scalar_lea.vmem %s4097_s5, %s3742_s2  ;;  %v3515_v2 = vmov 0.0   ;;  %vm3516_vm2 = vmmov 0  }
 0x1b7   : > { %v3195_v47 = vpack.c.bf16 %v871_v45, %v870_v44  ;;  %v873_v48 = vld [vmem:[%s3760_s25 + $0x18] sm:$0xff]  ;;  %v2952_v57 = vld [vmem:[%s4145_s26] ss:$0 sm:$0xff]  ;;  %3084 = vmatprep.subr.mxu0 %v3515_v2  ;;  %3086 = vmatprep.mubr.msk.f32.mxu0 %vm3516_vm2, %v3515_v2  ;;  %s4147_s18 = scalar_lea.vmem %s4099_s7, %s3742_s2  ;;  %s3517_s15 = smov 96   ;;  %vm965_vm3 = vcmask 64512   ;;  %vm2362_vm4 = vcmask 195584  }
 0x1b8   : > { %v3805_v30 = vld [vmem:[#allocation2] sm:$0xff]  ;;  %v3199_v49 = vpack.c.bf16 %v873_v48, %v872_v46  ;;  %s4148_s29 = sld [smem:[#allocation17_spill]]  ;;  %s3518_s0 = smov 64   ;;  %vm2359_vm5 = vcmask 130048   ;;  %vm2623_vm6 = vcmask 523264  }
 0x1b9   : > { %v827_v32 = vsel %vm826_vm1, %v3805_v30, 0.0  ;;  %3196 = vmatprep.subr.bf16.mxu1 %v3195_v47  ;;  %v2953_v59 = vld [vmem:[%s4146_s23] ss:$0 sm:$0xff]  ;;  %s3519_s26 = smov 88   ;;  %s3520_s25 = smov 120  }
 0x1ba   : > { %828 = vadd.xlane.f32.xlu0 %v827_v32  ;;  %3198 = vmatpush3.bf16.msra.mxu1 %v3195_v47  ;;  %v2954_v3 = vld [vmem:[%s4147_s18] ss:$0 sm:$0xff]  ;;  %s3521_s28 = smov 56   ;;  %s3522_s23 = smov 80  }
 0x1bb   : > { %3200 = vmatprep.subr.bf16.mxu1 %v3199_v49  ;;  %s3523_s19 = smov 112   ;;  %s3524_s22 = smov 48  }
 0x1bc   : > { %v3807_v31 = vld [vmem:[#allocation2 + $0x8] sm:$0xff]  ;;  %s3525_s18 = smov 72   ;;  %s3527_s14 = smov 40  }
 0x1bd   : > { %v830_v33 = vsel %vm826_vm1, %v3807_v31, 0.0  ;;  %s3528_s16 = smov 8   ;;  %s3529_s30 = smov 16  }
 0x1be   : > { %831 = vadd.xlane.f32.xlu0 %v830_v33  ;;  %3202 = vmatpush3.bf16.msra.mxu1 %v3199_v49  ;;  %v3865_v11 = vld [vmem:[%s4148_s29] ss:$0 sm:$0xff]  ;;  %v3871_v16 = vld [vmem:[%s4148_s29 + $0x1] ss:$0 sm:$0xff]  ;;  %s3530_s6 = smov 24   ;;  %p2994_p6 = scmp.ne.s32.totalorder %s3500_s21, 1 }
 0x1bf   : > { %3074 = vmatprep.subr.mxu1 %v3515_v2 }
 0x247   : > { %v829_v34 = vpop.xlane.xlu0 %828 }
 0x248   : > { %v834_v35 = vmul.f32 0.03125, %v829_v34 }
 0x24a   : > { %v836_v36 = vsub.f32 %v3805_v30, %v834_v35 }
 0x24b   : > { %v832_v37 = vpop.xlane.xlu0 %831 }
 0x24c   : > { %v835_v38 = vmul.f32 0.03125, %v832_v37  ;;  %v838_v39 = vmul.f32 %v836_v36, %v836_v36 }
 0x24e   : > { %v837_v40 = vsub.f32 %v3807_v31, %v835_v38  ;;  %v840_v41 = vsel %vm826_vm1, %v838_v39, 0.0 }
 0x24f   : > { %841 = vadd.xlane.f32.xlu1 %v840_v41 }
 0x250   : > { %v839_v42 = vmul.f32 %v837_v40, %v837_v40 }
 0x252   : > { %v843_v43 = vsel %vm826_vm1, %v839_v42, 0.0 }
 0x253   : > { %844 = vadd.xlane.f32.xlu1 %v843_v43 }
 0x2dc   : > { %v842_v50 = vpop.xlane.xlu1 %841 }
 0x2dd   : > { %v846_v51 = vmul.f32 0.03125, %v842_v50 }
 0x2df   : > { %v848_v52 = vadd.f32 1e-05, %v846_v51 }
 0x2e0   : > { %v845_v53 = vpop.xlane.xlu1 %844 }
 0x2e1   : > { %3320 = vrsqrt.f32 %v848_v52  ;;  %v847_v54 = vmul.f32 0.03125, %v845_v53 }
 0x2e3   : > { %v849_v55 = vadd.f32 1e-05, %v847_v54 }
 0x2e5   : > { %3322 = vrsqrt.f32 %v849_v55 }
 0x2eb   : > { %v3321_v56 = vpop.eup %3320 }
 0x2ec   : > { %v852_v58 = vmul.f32 %v3321_v56, %v836_v36 }
 0x2ee   : > { %v860_v60 = vmul.f32 %v2952_v57, %v852_v58 }
 0x2ef   : > { %v3323_v61 = vpop.eup %3322 }
 0x2f0   : > { %v853_v62 = vmul.f32 %v3323_v61, %v837_v40  ;;  %v868_v63 = vadd.f32 %v2953_v59, %v860_v60 }
 0x2f2   : > { %v861_v0 = vmul.f32 %v2952_v57, %v853_v62  ;;  %3071 = vmatprep.mubr.msk.f32.mxu1 %vm826_vm1, %v868_v63 }
 0x2f4   : > { %v869_v1 = vadd.f32 %v2953_v59, %v861_v0 }
 0x2f6   : > { %3072 = vmatmul.mubr.msk.f32.vlgmr.msra.gmra.mrb[0].mxu1 %vm826_vm1, %v869_v1 }
 0x2f7   : > { %3076 = vmatprep.mubr.msk.f32.mxu1 %vm3516_vm2, %v3515_v2 }
 0x3c9   : > { %v3073_v4 = vpop.f32.mrb[0].mxu1 }
 0x3ca   : > { %v3844_v5 = vadd.f32 %v3073_v4, %v2954_v3  ;;  %v953_v6 = vpop.f32.mrb[1].mxu1 }
 0x3cb   : > { %v3846_v7 = vadd.f32 %v2954_v3, %v953_v6 }
 0x3cc   : > { %1041 = vrot.lane.b32.xlu1 %v3844_v5, %s3517_s15 }
 0x3cd   : > { %963 = vrot.lane.b32.xlu0 %v3846_v7, %s3517_s15  ;;  %s3526_s15 = smov 104  }
 0x43e   : > { %v1042_v9 = vpop.permute.xlu1 %1041 }
 0x43f   : > { %v964_v8 = vpop.permute.xlu0 %963 }
 0x440   : > { %3075 = vmatpush3.xpose.msk.msra.mxu1 %vm965_vm3, %v964_v8 }
 0x441   : > { %3079 = vmatprep.subr.mxu1 %v3515_v2 }
 0x443   : > { %3077 = vmatmul.mubr.msk.f32.vlgmr.msra.gmra.mrb[2].mxu1 %vm965_vm3, %v3846_v7 }
 0x444   : > { %3080 = vmatpush3.xpose.msk.msra.mxu1 %vm965_vm3, %v1042_v9  ;;  %3081 = vmatprep.mubr.msk.f32.mxu1 %vm3516_vm2, %v3515_v2 }
 0x445   : > { %3089 = vmatprep.subr.mxu1 %v3515_v2 }
 0x447   : > { %3082 = vmatmul.mubr.msk.f32.vlgmr.msra.gmra.mrb[4].mxu1 %vm965_vm3, %v3844_v5 }
 0x448   : > { %3091 = vmatprep.mubr.msk.f32.mxu1 %vm3516_vm2, %v3515_v2 }
 0x516   : > { %v1036_v10 = vpop.f32.mrb[2].mxu1 }
 0x517   : > { %v1117_v12 = vmul.f32 0.35355338, %v1036_v10  ;;  %v3078_v13 = vpop.f32.mrb[3].mxu1 }
 0x519   : > { %v1131_v14 = vadd.f32 %v3865_v11, %v1117_v12 }
 0x51a   : > { %v1113_v15 = vpop.f32.mrb[4].mxu1 }
 0x51b   : > { %v1118_v17 = vmul.f32 0.35355338, %v1113_v15  ;;  %v3083_v18 = vpop.f32.mrb[5].mxu1  ;;  %v1133_v19 = vsel %vm965_vm3, %v1131_v14, -inf }
 0x51c   : > { %1134 = vmax.xlane.f32.xlu1 %v1133_v19 }
 0x51d   : > { %v1132_v20 = vadd.f32 %v3871_v16, %v1118_v17 }
 0x51f   : > { %v1136_v21 = vsel %vm965_vm3, %v1132_v20, -inf }
 0x520   : > { %1137 = vmax.xlane.f32.xlu0 %v1136_v21 }
 0x52d   : > { %1237 = vrot.lane.b32.xlu1 %v3844_v5, %s3518_s0 }
 0x531   : > { %1315 = vrot.lane.b32.xlu1 %v3846_v7, %s3519_s26 }
 0x5a9   : > { %v1135_v22 = vpop.xlane.xlu1 %1134 }
 0x5aa   : > { %v1139_v23 = vsub.f32 %v1131_v14, %v1135_v22 }
 0x5ac   : > { %v1141_v24 = vmul.f32 1.442695, %v1139_v23 }
 0x5ad   : > { %v1238_v25 = vpop.permute.xlu1 %1237  ;;  %v1138_v26 = vpop.xlane.xlu0 %1137 }
 0x5ae   : > { %3324 = vpow2.f32 %v1141_v24  ;;  %v1140_v27 = vsub.f32 %v1132_v20, %v1138_v26  ;;  %3090 = vmatpush3.msra.mxu1 %v1238_v25 }
 0x5af   : > { %3099 = vmatprep.subr.mxu1 %v3515_v2 }
 0x5b0   : > { %v1143_v28 = vmul.f32 1.442695, %v1140_v27 }
 0x5b1   : > { %v1316_v35 = vpop.permute.xlu1 %1315 }
 0x5b2   : > { %3326 = vpow2.f32 %v1143_v28 }
 0x5b8   : > { %v3325_v29 = vpop.eup %3324 }
 0x5b9   : > { %v1145_v32 = vsel %vm965_vm3, %v3325_v29, 0.0 }
 0x5ba   : > { %1146 = vadd.xlane.f32.xlu0 %v1145_v32 }
 0x5bc   : > { %v3327_v33 = vpop.eup %3326 }
 0x5bd   : > { %v1148_v34 = vsel %vm965_vm3, %v3327_v33, 0.0 }
 0x5be   : > { %1149 = vadd.xlane.f32.xlu1 %v1148_v34 }
 0x5cf   : > { %1393 = vrot.lane.b32.xlu1 %v3844_v5, %s3519_s26  ;;  %s4149_s26 = scalar_lea.vmem %s4101_s9, %s3742_s2 }
 0x5d0   : > { %1161 = vrot.lane.b32.xlu0 %v3846_v7, %s3518_s0 }
 0x5d3   : > { %1391 = vrot.lane.b32.xlu1 %v3844_v5, %s3520_s25 }
 0x5d4   : > { %1313 = vrot.lane.b32.xlu0 %v3846_v7, %s3520_s25 }
 0x647   : > { %v1147_v36 = vpop.xlane.xlu0 %1146 }
 0x648   : > { %3328 = vrcp.f32 %v1147_v36 }
 0x64b   : > { %v1150_v37 = vpop.xlane.xlu1 %1149  ;;  %v1162_v38 = vpop.permute.xlu0 %1161 }
 0x64c   : > { %3330 = vrcp.f32 %v1150_v37  ;;  %3085 = vmatpush3.msra.mxu0 %v1162_v38 }
 0x64d   : > { %3094 = vmatprep.subr.mxu0 %v3515_v2 }
 0x64f   : > { %v1394_v48 = vpop.permute.xlu1 %1393  ;;  %v1314_v50 = vpop.permute.xlu0 %1313 }
 0x652   : > { %v3329_v39 = vpop.eup %3328 }
 0x653   : > { %v1153_v40 = vmul.f32 %v3329_v39, %v1147_v36  ;;  %v1392_v51 = vpop.permute.xlu1 %1391 }
 0x655   : > { %v1155_v41 = vsub.f32 2.0, %v1153_v40 }
 0x656   : > { %v3331_v42 = vpop.eup %3330 }
 0x657   : > { %v1157_v43 = vmul.f32 %v3329_v39, %v1155_v41  ;;  %v1154_v44 = vmul.f32 %v3331_v42, %v1150_v37 }
 0x659   : > { %v1159_v45 = vmul.f32 %v3325_v29, %v1157_v43  ;;  %v1156_v46 = vsub.f32 2.0, %v1154_v44 }
 0x65b   : > { %v1158_v47 = vmul.f32 %v3331_v42, %v1156_v46  ;;  %3087 = vmatmul.mubr.msk.f32.vlgmr.msra.gmra.mrb[0].mxu0 %vm965_vm3, %v1159_v45 }
 0x65c   : > { %3095 = vmatpush3.xpose.msk.msra.mxu0 %vm965_vm3, %v1316_v35  ;;  %3096 = vmatprep.mubr.msk.f32.mxu0 %vm3516_vm2, %v3515_v2 }
 0x65d   : > { %v1160_v49 = vmul.f32 %v3327_v33, %v1158_v47  ;;  %3104 = vmatprep.subr.mxu0 %v3515_v2 }
 0x65f   : > { %3092 = vmatmul.mubr.msk.f32.vlgmr.msra.gmra.mrb[6].mxu1 %vm965_vm3, %v1160_v49  ;;  %3097 = vmatmul.mubr.msk.f32.vlgmr.msra.gmra.mrb[2].mxu0 %vm965_vm3, %v1314_v50 }
 0x660   : > { %3100 = vmatpush3.xpose.msk.msra.mxu1 %vm965_vm3, %v1394_v48  ;;  %3101 = vmatprep.mubr.msk.f32.mxu1 %vm3516_vm2, %v3515_v2 }
 0x661   : > { %3109 = vmatprep.subr.mxu1 %v3515_v2  ;;  %3106 = vmatprep.mubr.msk.f32.mxu0 %vm3516_vm2, %v3515_v2 }
 0x663   : > { %3102 = vmatmul.mubr.msk.f32.vlgmr.msra.gmra.mrb[8].mxu1 %vm965_vm3, %v1392_v51 }
 0x664   : > { %3111 = vmatprep.mubr.msk.f32.mxu1 %vm3516_vm2, %v3515_v2 }
 0x72e   : > { %v3902_v52 = vpop.f32.mrb[0].mxu0 }
 0x72f   : > { %v3088_v53 = vpop.f32.mrb[1].mxu0 }
 0x732   : > { %v3904_v54 = vpop.f32.mrb[6].mxu1  ;;  %v1387_v55 = vpop.f32.mrb[2].mxu0 }
 0x733   : > { %v1469_v56 = vmul.f32 0.35355338, %v1387_v55  ;;  %v3093_v57 = vpop.f32.mrb[7].mxu1  ;;  %v3098_v58 = vpop.f32.mrb[3].mxu0 }
 0x735   : > { %v1471_v59 = vadd.f32 %v3865_v11, %v1469_v56 }
 0x736   : > { %v1465_v60 = vpop.f32.mrb[8].mxu1 }
 0x737   : > { %v1470_v61 = vmul.f32 0.35355338, %v1465_v60  ;;  %v3103_v62 = vpop.f32.mrb[9].mxu1  ;;  %v1473_v63 = vsel %vm965_vm3, %v1471_v59, -inf }
 0x738   : > { %1474 = vmax.xlane.f32.xlu0 %v1473_v63 }
 0x739   : > { %v1472_v0 = vadd.f32 %v3871_v16, %v1470_v61 }
 0x73b   : > { %v1476_v1 = vsel %vm965_vm3, %v1472_v0, -inf }
 0x73c   : > { %1477 = vmax.xlane.f32.xlu1 %v1476_v1 }
 0x74d   : > { %1577 = vrot.lane.b32.xlu1 %v3844_v5, %s3521_s28 }
 0x751   : > { %1655 = vrot.lane.b32.xlu1 %v3846_v7, %s3522_s23 }
 0x755   : > { %1733 = vrot.lane.b32.xlu1 %v3844_v5, %s3522_s23  ;;  %s4150_s23 = scalar_lea.vmem %s4102_s10, %s3742_s2 }
 0x759   : > { %1731 = vrot.lane.b32.xlu1 %v3844_v5, %s3523_s19 }
 0x7c5   : > { %v1475_v3 = vpop.xlane.xlu0 %1474 }
 0x7c6   : > { %v1479_v4 = vsub.f32 %v1471_v59, %v1475_v3 }
 0x7c8   : > { %v1481_v6 = vmul.f32 1.442695, %v1479_v4 }
 0x7c9   : > { %v1478_v8 = vpop.xlane.xlu1 %1477 }
 0x7ca   : > { %3332 = vpow2.f32 %v1481_v6  ;;  %v1480_v9 = vsub.f32 %v1472_v0, %v1478_v8 }
 0x7cc   : > { %v1483_v10 = vmul.f32 1.442695, %v1480_v9 }
 0x7cd   : > { %v1578_v12 = vpop.permute.xlu1 %1577 }
 0x7ce   : > { %3334 = vpow2.f32 %v1483_v10  ;;  %3110 = vmatpush3.msra.mxu1 %v1578_v12 }
 0x7cf   : > { %3119 = vmatprep.subr.mxu1 %v3515_v2 }
 0x7d1   : > { %v1656_v25 = vpop.permute.xlu1 %1655 }
 0x7d4   : > { %v3333_v13 = vpop.eup %3332 }
 0x7d5   : > { %v1485_v14 = vsel %vm965_vm3, %v3333_v13, 0.0  ;;  %v1734_v33 = vpop.permute.xlu1 %1733 }
 0x7d6   : > { %1486 = vadd.xlane.f32.xlu0 %v1485_v14 }
 0x7d8   : > { %v3335_v15 = vpop.eup %3334 }
 0x7d9   : > { %v1488_v17 = vsel %vm965_vm3, %v3335_v15, 0.0  ;;  %v1732_v36 = vpop.permute.xlu1 %1731 }
 0x7da   : > { %1489 = vadd.xlane.f32.xlu0 %v1488_v17 }
 0x7f0   : > { %1501 = vrot.lane.b32.xlu0 %v3846_v7, %s3521_s28 }
 0x7f4   : > { %1653 = vrot.lane.b32.xlu0 %v3846_v7, %s3523_s19 }
 0x863   : > { %v1487_v18 = vpop.xlane.xlu0 %1486 }
 0x864   : > { %3336 = vrcp.f32 %v1487_v18 }
 0x867   : > { %v1490_v19 = vpop.xlane.xlu0 %1489 }
 0x868   : > { %3338 = vrcp.f32 %v1490_v19 }
 0x86b   : > { %v1502_v20 = vpop.permute.xlu0 %1501 }
 0x86c   : > { %3105 = vmatpush3.msra.mxu0 %v1502_v20 }
 0x86d   : > { %3114 = vmatprep.subr.mxu0 %v3515_v2 }
 0x86e   : > { %v3337_v21 = vpop.eup %3336 }
 0x86f   : > { %v1493_v22 = vmul.f32 %v3337_v21, %v1487_v18  ;;  %v1654_v35 = vpop.permute.xlu0 %1653 }
 0x871   : > { %v1495_v23 = vsub.f32 2.0, %v1493_v22 }
 0x872   : > { %v3339_v24 = vpop.eup %3338 }
 0x873   : > { %v1497_v26 = vmul.f32 %v3337_v21, %v1495_v23  ;;  %v1494_v27 = vmul.f32 %v3339_v24, %v1490_v19 }
 0x875   : > { %v1499_v28 = vmul.f32 %v3333_v13, %v1497_v26  ;;  %v1496_v29 = vsub.f32 2.0, %v1494_v27 }
 0x877   : > { %v1498_v32 = vmul.f32 %v3339_v24, %v1496_v29  ;;  %3107 = vmatmul.mubr.msk.f32.vlgmr.msra.gmra.mrb[4].mxu0 %vm965_vm3, %v1499_v28 }
 0x878   : > { %3115 = vmatpush3.xpose.msk.msra.mxu0 %vm965_vm3, %v1656_v25  ;;  %3116 = vmatprep.mubr.msk.f32.mxu0 %vm3516_vm2, %v3515_v2 }
 0x879   : > { %v1500_v34 = vmul.f32 %v3335_v15, %v1498_v32  ;;  %3124 = vmatprep.subr.mxu0 %v3515_v2 }
 0x87b   : > { %3112 = vmatmul.mubr.msk.f32.vlgmr.msra.gmra.mrb[10].mxu1 %vm965_vm3, %v1500_v34  ;;  %3117 = vmatmul.mubr.msk.f32.vlgmr.msra.gmra.mrb[6].mxu0 %vm965_vm3, %v1654_v35 }
 0x87c   : > { %3120 = vmatpush3.xpose.msk.msra.mxu1 %vm965_vm3, %v1734_v33  ;;  %3121 = vmatprep.mubr.msk.f32.mxu1 %vm3516_vm2, %v3515_v2 }
 0x87d   : > { %3129 = vmatprep.subr.mxu1 %v3515_v2  ;;  %3126 = vmatprep.mubr.msk.f32.mxu0 %vm3516_vm2, %v3515_v2 }
 0x87f   : > { %3122 = vmatmul.mubr.msk.f32.vlgmr.msra.gmra.mrb[12].mxu1 %vm965_vm3, %v1732_v36 }
 0x880   : > { %3131 = vmatprep.mubr.msk.f32.mxu1 %vm3516_vm2, %v3515_v2 }
 0x94a   : > { %v3936_v37 = vpop.f32.mrb[4].mxu0 }
 0x94b   : > { %v3108_v38 = vpop.f32.mrb[5].mxu0 }
 0x94e   : > { %v3938_v39 = vpop.f32.mrb[10].mxu1  ;;  %v1727_v40 = vpop.f32.mrb[6].mxu0 }
 0x94f   : > { %v1809_v41 = vmul.f32 0.35355338, %v1727_v40  ;;  %v3113_v42 = vpop.f32.mrb[11].mxu1  ;;  %v3118_v43 = vpop.f32.mrb[7].mxu0 }
 0x951   : > { %v1811_v44 = vadd.f32 %v3865_v11, %v1809_v41 }
 0x952   : > { %v1805_v45 = vpop.f32.mrb[12].mxu1 }
 0x953   : > { %v1810_v46 = vmul.f32 0.35355338, %v1805_v45  ;;  %v3123_v47 = vpop.f32.mrb[13].mxu1  ;;  %v1813_v48 = vsel %vm965_vm3, %v1811_v44, -inf }
 0x954   : > { %1814 = vmax.xlane.f32.xlu0 %v1813_v48 }
 0x955   : > { %v1812_v49 = vadd.f32 %v3871_v16, %v1810_v46 }
 0x957   : > { %v1816_v50 = vsel %vm965_vm3, %v1812_v49, -inf }
 0x958   : > { %1817 = vmax.xlane.f32.xlu1 %v1816_v50 }
 0x969   : > { %1917 = vrot.lane.b32.xlu1 %v3844_v5, %s3524_s22 }
 0x96d   : > { %1995 = vrot.lane.b32.xlu1 %v3846_v7, %s3525_s18 }
 0x971   : > { %2073 = vrot.lane.b32.xlu1 %v3844_v5, %s3525_s18 }
 0x975   : > { %2071 = vrot.lane.b32.xlu1 %v3844_v5, %s3526_s15 }
 0x9e1   : > { %v1815_v51 = vpop.xlane.xlu0 %1814 }
 0x9e2   : > { %v1819_v53 = vsub.f32 %v1811_v44, %v1815_v51 }
 0x9e4   : > { %v1821_v55 = vmul.f32 1.442695, %v1819_v53 }
 0x9e5   : > { %v1818_v56 = vpop.xlane.xlu1 %1817 }
 0x9e6   : > { %3340 = vpow2.f32 %v1821_v55  ;;  %v1820_v57 = vsub.f32 %v1812_v49, %v1818_v56 }
 0x9e8   : > { %v1823_v58 = vmul.f32 1.442695, %v1820_v57 }
 0x9e9   : > { %v1918_v59 = vpop.permute.xlu1 %1917 }
 0x9ea   : > { %3342 = vpow2.f32 %v1823_v58  ;;  %3130 = vmatpush3.msra.mxu1 %v1918_v59  ;;  %v2365_v59 = vld [vmem:[%s3765_s1] sm:$0xff] }
 0x9eb   : > { %3139 = vmatprep.subr.mxu1 %v3515_v2 }
 0x9ed   : > { %v1996_v10 = vpop.permute.xlu1 %1995 }
 0x9f0   : > { %v3341_v60 = vpop.eup %3340 }
 0x9f1   : > { %v1825_v61 = vsel %vm965_vm3, %v3341_v60, 0.0  ;;  %v2074_v18 = vpop.permute.xlu1 %2073 }
 0x9f2   : > { %1826 = vadd.xlane.f32.xlu0 %v1825_v61 }
 0x9f4   : > { %v3343_v62 = vpop.eup %3342 }
 0x9f5   : > { %v1828_v63 = vsel %vm965_vm3, %v3343_v62, 0.0  ;;  %v2072_v21 = vpop.permute.xlu1 %2071 }
 0x9f6   : > { %1829 = vadd.xlane.f32.xlu0 %v1828_v63  ;;  %v2368_v63 = vld [vmem:[%s3765_s1 + $0x18] sm:$0xff] }
 0xa0c   : > { %1841 = vrot.lane.b32.xlu0 %v3846_v7, %s3524_s22 }
 0xa10   : > { %1993 = vrot.lane.b32.xlu0 %v3846_v7, %s3526_s15 }
 0xa7f   : > { %v1827_v0 = vpop.xlane.xlu0 %1826 }
 0xa80   : > { %3344 = vrcp.f32 %v1827_v0 }
 0xa83   : > { %v1830_v1 = vpop.xlane.xlu0 %1829 }
 0xa84   : > { %3346 = vrcp.f32 %v1830_v1 }
 0xa87   : > { %v1842_v3 = vpop.permute.xlu0 %1841 }
 0xa88   : > { %3125 = vmatpush3.msra.mxu0 %v1842_v3 }
 0xa89   : > { %3134 = vmatprep.subr.mxu0 %v3515_v2 }
 0xa8a   : > { %v3345_v4 = vpop.eup %3344 }
 0xa8b   : > { %v1833_v6 = vmul.f32 %v3345_v4, %v1827_v0  ;;  %v1994_v20 = vpop.permute.xlu0 %1993 }
 0xa8d   : > { %v1835_v8 = vsub.f32 2.0, %v1833_v6 }
 0xa8e   : > { %v3347_v9 = vpop.eup %3346 }
 0xa8f   : > { %v1837_v12 = vmul.f32 %v3345_v4, %v1835_v8  ;;  %v1834_v13 = vmul.f32 %v3347_v9, %v1830_v1 }
 0xa91   : > { %v1839_v14 = vmul.f32 %v3341_v60, %v1837_v12  ;;  %v1836_v15 = vsub.f32 2.0, %v1834_v13  ;;  %v2366_v60 = vld [vmem:[%s3765_s1 + $0x8] sm:$0xff] }
 0xa92   : > { %v3203_v61 = vpack.c.bf16 %v2366_v60, %v2365_v59  ;;  %v2609_v59 = vld [vmem:[%s3792_s8 + $0x8] sm:$0xff] }
 0xa93   : > { %v1838_v17 = vmul.f32 %v3347_v9, %v1836_v15  ;;  %3127 = vmatmul.mubr.msk.f32.vlgmr.msra.gmra.mrb[8].mxu0 %vm965_vm3, %v1839_v14 }
 0xa94   : > { %3135 = vmatpush3.xpose.msk.msra.mxu0 %vm965_vm3, %v1996_v10  ;;  %3136 = vmatprep.mubr.msk.f32.mxu0 %vm3516_vm2, %v3515_v2 }
 0xa95   : > { %v1840_v19 = vmul.f32 %v3343_v62, %v1838_v17  ;;  %3144 = vmatprep.subr.mxu0 %v3515_v2  ;;  %v2367_v62 = vld [vmem:[%s3765_s1 + $0x10] sm:$0xff] }
 0xa96   : > { %v3207_v0 = vpack.c.bf16 %v2368_v63, %v2367_v62  ;;  %v2611_v62 = vld [vmem:[%s3792_s8 + $0x18] sm:$0xff] }
 0xa97   : > { %3132 = vmatmul.mubr.msk.f32.vlgmr.msra.gmra.mrb[14].mxu1 %vm965_vm3, %v1840_v19  ;;  %3137 = vmatmul.mubr.msk.f32.vlgmr.msra.gmra.mrb[10].mxu0 %vm965_vm3, %v1994_v20 }
 0xa98   : > { %3140 = vmatpush3.xpose.msk.msra.mxu1 %vm965_vm3, %v2074_v18  ;;  %3141 = vmatprep.mubr.msk.f32.mxu1 %vm3516_vm2, %v3515_v2 }
 0xa99   : > { %3149 = vmatprep.subr.mxu1 %v3515_v2  ;;  %3146 = vmatprep.mubr.msk.f32.mxu0 %vm3516_vm2, %v3515_v2 }
 0xa9b   : > { %3142 = vmatmul.mubr.msk.f32.vlgmr.msra.gmra.mrb[16].mxu1 %vm965_vm3, %v2072_v21 }
 0xa9c   : > { %3151 = vmatprep.mubr.msk.f32.mxu1 %vm3516_vm2, %v3515_v2 }
 0xb66   : > { %v1913_v22 = vpop.f32.mrb[8].mxu0 }
 0xb67   : > { %v3128_v23 = vpop.f32.mrb[9].mxu0 }
 0xb6a   : > { %v1989_v24 = vpop.f32.mrb[14].mxu1  ;;  %v2067_v25 = vpop.f32.mrb[10].mxu0 }
 0xb6b   : > { %v2149_v26 = vmul.f32 0.35355338, %v2067_v25  ;;  %v3133_v27 = vpop.f32.mrb[15].mxu1  ;;  %v3138_v28 = vpop.f32.mrb[11].mxu0 }
 0xb6d   : > { %v2151_v29 = vadd.f32 %v3865_v11, %v2149_v26 }
 0xb6e   : > { %v2145_v32 = vpop.f32.mrb[16].mxu1 }
 0xb6f   : > { %v2150_v33 = vmul.f32 0.35355338, %v2145_v32  ;;  %v3143_v34 = vpop.f32.mrb[17].mxu1  ;;  %v2153_v35 = vsel %vm965_vm3, %v2151_v29, -inf }
 0xb70   : > { %2154 = vmax.xlane.f32.xlu0 %v2153_v35 }
 0xb71   : > { %v2152_v36 = vadd.f32 %v3871_v16, %v2150_v33 }
 0xb73   : > { %v2156_v38 = vsel %vm965_vm3, %v2152_v36, -inf }
 0xb74   : > { %2157 = vmax.xlane.f32.xlu1 %v2156_v38 }
 0xb85   : > { %2257 = vrot.lane.b32.xlu1 %v3844_v5, %s3527_s14 }
 0xb89   : > { %2335 = vrot.lane.b32.xlu1 %v3936_v37, %s3528_s16 }
 0xb8d   : > { %2337 = vrot.lane.b32.xlu1 %v3938_v39, %s3528_s16 }
 0xb91   : > { %2345 = vrot.lane.b32.xlu1 %v1989_v24, %s3529_s30 }
 0xbfd   : > { %v2155_v2 = vpop.xlane.xlu0 %2154 }
 0xbfe   : > { %v2159_v11 = vsub.f32 %v2151_v29, %v2155_v2 }
 0xc00   : > { %v2161_v40 = vmul.f32 1.442695, %v2159_v11  ;;  %v2505_v11 = vld [vmem:[%s3782_s27] sm:$0xff] }
 0xc01   : > { %v2158_v41 = vpop.xlane.xlu1 %2157 }
 0xc02   : > { %3348 = vpow2.f32 %v2161_v40  ;;  %v2160_v16 = vsub.f32 %v2152_v36, %v2158_v41  ;;  %v2506_v40 = vld [vmem:[%s3782_s27 + $0x8] sm:$0xff] }
 0xc03   : > { %v3211_v41 = vpack.c.bf16 %v2506_v40, %v2505_v11 }
 0xc04   : > { %v2163_v42 = vmul.f32 1.442695, %v2160_v16  ;;  %v2507_v16 = vld [vmem:[%s3782_s27 + $0x10] sm:$0xff] }
 0xc05   : > { %v2258_v43 = vpop.permute.xlu1 %2257 }
 0xc06   : > { %3350 = vpow2.f32 %v2163_v42  ;;  %3150 = vmatpush3.msra.mxu1 %v2258_v43  ;;  %v2508_v42 = vld [vmem:[%s3782_s27 + $0x18] sm:$0xff] }
 0xc07   : > { %3212 = vmatprep.subr.bf16.mxu1 %v3211_v41  ;;  %v3215_v43 = vpack.c.bf16 %v2508_v42, %v2507_v16 }
 0xc09   : > { %v2336_v8 = vpop.permute.xlu1 %2335 }
 0xc0a   : > { %v2357_v12 = vsel %vm965_vm3, %v3902_v52, %v2336_v8  ;;  %v2985_v52 = vld [vmem:[%s4149_s26] ss:$0 sm:$0xff] }
 0xc0c   : > { %v3349_v5 = vpop.eup %3348 }
 0xc0d   : > { %v2165_v44 = vsel %vm965_vm3, %v3349_v5, 0.0  ;;  %v2338_v9 = vpop.permute.xlu1 %2337 }
 0xc0e   : > { %2166 = vadd.xlane.f32.xlu0 %v2165_v44  ;;  %v2358_v18 = vsel %vm965_vm3, %v3904_v54, %v2338_v9  ;;  %v2988_v9 = vld [vmem:[%s756_s3] ss:$0 sm:$0xff] }
 0xc10   : > { %v3351_v37 = vpop.eup %3350 }
 0xc11   : > { %v2168_v45 = vsel %vm965_vm3, %v3351_v37, 0.0  ;;  %v2346_v13 = vpop.permute.xlu1 %2345 }
 0xc12   : > { %2169 = vadd.xlane.f32.xlu0 %v2168_v45  ;;  %v2361_v19 = vsel %vm2359_vm5, %v2358_v18, %v2346_v13 }
 0xc28   : > { %2181 = vrot.lane.b32.xlu0 %v3846_v7, %s3527_s14 }
 0xc2c   : > { %2343 = vrot.lane.b32.xlu0 %v1913_v22, %s3529_s30 }
 0xc9b   : > { %v2167_v39 = vpop.xlane.xlu0 %2166 }
 0xc9c   : > { %3352 = vrcp.f32 %v2167_v39 }
 0xc9f   : > { %v2170_v46 = vpop.xlane.xlu0 %2169 }
 0xca0   : > { %3354 = vrcp.f32 %v2170_v46 }
 0xca3   : > { %v2182_v47 = vpop.permute.xlu0 %2181 }
 0xca4   : > { %3145 = vmatpush3.msra.mxu0 %v2182_v47 }
 0xca5   : > { %3204 = vmatprep.subr.bf16.mxu0 %v3203_v61 }
 0xca6   : > { %v3353_v48 = vpop.eup %3352 }
 0xca7   : > { %v2173_v49 = vmul.f32 %v3353_v48, %v2167_v39  ;;  %v2344_v10 = vpop.permute.xlu0 %2343 }
 0xca8   : > { %v2360_v14 = vsel %vm2359_vm5, %v2357_v12, %v2344_v10 }
 0xca9   : > { %v2175_v50 = vsub.f32 2.0, %v2173_v49 }
 0xcaa   : > { %v3355_v51 = vpop.eup %3354 }
 0xcab   : > { %v2177_v53 = vmul.f32 %v3353_v48, %v2175_v50  ;;  %v2174_v55 = vmul.f32 %v3355_v51, %v2170_v46  ;;  %v2986_v48 = vld [vmem:[%s4150_s23] ss:$0 sm:$0xff] }
 0xcac   : > { %v2987_v50 = vld [vmem:[%s748_s24] ss:$0 sm:$0xff] }
 0xcad   : > { %v2179_v56 = vmul.f32 %v3349_v5, %v2177_v53  ;;  %v2176_v57 = vsub.f32 2.0, %v2174_v55 }
 0xcaf   : > { %v2178_v7 = vmul.f32 %v3355_v51, %v2176_v57  ;;  %3147 = vmatmul.mubr.msk.f32.vlgmr.msra.gmra.mrb[12].mxu0 %vm965_vm3, %v2179_v56 }
 0xcb0   : > { %3206 = vmatpush3.bf16.msra.mxu0 %v3203_v61  ;;  %v2610_v61 = vld [vmem:[%s3792_s8 + $0x10] sm:$0xff] }
 0xcb1   : > { %v2180_v58 = vmul.f32 %v3351_v37, %v2178_v7  ;;  %3208 = vmatprep.subr.bf16.mxu0 %v3207_v0  ;;  %v3223_v63 = vpack.c.bf16 %v2611_v62, %v2610_v61 }
 0xcb3   : > { %3152 = vmatmul.mubr.msk.f32.vlgmr.msra.gmra.mrb[18].mxu1 %vm965_vm3, %v2180_v58  ;;  %v2608_v58 = vld [vmem:[%s3792_s8] sm:$0xff] }
 0xcb4   : > { %3210 = vmatpush3.bf16.msra.mxu0 %v3207_v0  ;;  %3214 = vmatpush3.bf16.msra.mxu1 %v3211_v41  ;;  %v3219_v60 = vpack.c.bf16 %v2609_v59, %v2608_v58  ;;  %v2612_v0 = vld [vmem:[%s3792_s8 + $0x20] sm:$0xff] }
 0xcb5   : > { %3216 = vmatprep.subr.bf16.mxu1 %v3215_v43 }
 0xcb6   : > { %3220 = vmatprep.subr.bf16.mxu0 %v3219_v60 }
 0xcb8   : > { %3218 = vmatpush3.bf16.msra.mxu1 %v3215_v43 }
 0xd82   : > { %v2253_v1 = vpop.f32.mrb[12].mxu0 }
 0xd83   : > { %2351 = vrot.lane.b32.xlu0 %v2253_v1, %s3530_s6  ;;  %v3148_v3 = vpop.f32.mrb[13].mxu0  ;;  %v2613_v1 = vld [vmem:[%s3792_s8 + $0x28] sm:$0xff] }
 0xd84   : > { %v3227_v3 = vpack.c.bf16 %v2613_v1, %v2612_v0 }
 0xd86   : > { %v2329_v4 = vpop.f32.mrb[18].mxu1 }
 0xd87   : > { %2353 = vrot.lane.b32.xlu1 %v2329_v4, %s3530_s6  ;;  %v3153_v6 = vpop.f32.mrb[19].mxu1  ;;  %v2614_v4 = vld [vmem:[%s3792_s8 + $0x30] sm:$0xff] }
 0xd88   : > { %v2615_v6 = vld [vmem:[%s3792_s8 + $0x38] sm:$0xff] }
 0xd89   : > { %v3231_v8 = vpack.c.bf16 %v2615_v6, %v2614_v4 }
 0xdf5   : > { %v2352_v15 = vpop.permute.xlu0 %2351 }
 0xdf6   : > { %v2363_v17 = vsel %vm2362_vm4, %v2360_v14, %v2352_v15 }
 0xdf7   : > { %3162 = vmatprep.mubr.msk.f32.mxu0 %vm826_vm1, %v2363_v17 }
 0xdf9   : > { %v2354_v20 = vpop.permute.xlu1 %2353 }
 0xdfa   : > { %v2364_v21 = vsel %vm2362_vm4, %v2361_v19, %v2354_v20 }
 0xdfb   : > { %3163 = vmatmul.mubr.msk.f32.vlgmr.msra.gmra.mrb[14].mxu0 %vm826_vm1, %v2364_v21 }
 0xdfc   : > { %3222 = vmatpush3.bf16.msra.mxu0 %v3219_v60 }
 0xdfd   : > { %3224 = vmatprep.subr.bf16.mxu0 %v3223_v63 }
 0xe00   : > { %3226 = vmatpush3.bf16.msra.mxu0 %v3223_v63 }
 0xe01   : > { %3228 = vmatprep.subr.bf16.mxu0 %v3227_v3 }
 0xe04   : > { %3230 = vmatpush3.bf16.msra.mxu0 %v3227_v3 }
 0xe05   : > { %3232 = vmatprep.subr.bf16.mxu0 %v3231_v8 }
 0xe08   : > { %3234 = vmatpush3.bf16.msra.mxu0 %v3231_v8 }
 0xece   : > { %v3164_v22 = vpop.f32.mrb[14].mxu0 }
 0xecf   : > { %v2451_v23 = vadd.f32 %v3164_v22, %v3807_v31  ;;  %v2441_v24 = vpop.f32.mrb[15].mxu0 }
 0xed0   : > { %v2450_v25 = vadd.f32 %v2441_v24, %v3805_v30 }
 0xed1   : > { %v4001_v26 = vadd.f32 %v2985_v52, %v2451_v23 }
 0xed2   : > { %v4003_v27 = vadd.f32 %v2985_v52, %v2450_v25  ;;  %v2991_v25 = vld [vmem:[%s764_s20] ss:$0 sm:$0xff] }
 0xed3   : > { %v2466_v54 = vsel %vm826_vm1, %v4001_v26, 0.0 }
 0xed4   : > { %2467 = vadd.xlane.f32.xlu1 %v2466_v54  ;;  %v2463_v28 = vsel %vm826_vm1, %v4003_v27, 0.0 }
 0xed5   : > { %2464 = vadd.xlane.f32.xlu0 %v2463_v28 }
 0xf61   : > { %v2468_v29 = vpop.xlane.xlu1 %2467 }
 0xf62   : > { %v2470_v32 = vmul.f32 0.03125, %v2468_v29  ;;  %v2465_v31 = vpop.xlane.xlu0 %2464 }
 0xf63   : > { %v2469_v30 = vmul.f32 0.03125, %v2465_v31 }
 0xf64   : > { %v2472_v33 = vsub.f32 %v4001_v26, %v2470_v32 }
 0xf65   : > { %v2471_v34 = vsub.f32 %v4003_v27, %v2469_v30 }
 0xf66   : > { %v2474_v38 = vmul.f32 %v2472_v33, %v2472_v33 }
 0xf67   : > { %v2473_v35 = vmul.f32 %v2471_v34, %v2471_v34 }
 0xf68   : > { %v2478_v2 = vsel %vm826_vm1, %v2474_v38, 0.0 }
 0xf69   : > { %v2475_v36 = vsel %vm826_vm1, %v2473_v35, 0.0 }
 0xf6a   : > { %2476 = vadd.xlane.f32.xlu0 %v2475_v36 }
 0xf6e   : > { %2479 = vadd.xlane.f32.xlu0 %v2478_v2 }
 0xff7   : > { %v2477_v5 = vpop.xlane.xlu0 %2476 }
 0xff8   : > { %v2481_v44 = vmul.f32 0.03125, %v2477_v5 }
 0xffa   : > { %v2483_v37 = vadd.f32 1e-05, %v2481_v44 }
 0xffb   : > { %v2480_v45 = vpop.xlane.xlu0 %2479 }
 0xffc   : > { %3356 = vrsqrt.f32 %v2483_v37  ;;  %v2482_v39 = vmul.f32 0.03125, %v2480_v45 }
 0xffe   : > { %v2484_v46 = vadd.f32 1e-05, %v2482_v39 }
0x1000   : > { %3358 = vrsqrt.f32 %v2484_v46 }
0x1006   : > { %v3357_v47 = vpop.eup %3356 }
0x1007   : > { %v2487_v49 = vmul.f32 %v3357_v47, %v2471_v34 }
0x1009   : > { %v2495_v51 = vmul.f32 %v2986_v48, %v2487_v49 }
0x100a   : > { %v3359_v53 = vpop.eup %3358 }
0x100b   : > { %v2488_v55 = vmul.f32 %v3359_v53, %v2472_v33  ;;  %v2503_v56 = vadd.f32 %v2987_v50, %v2495_v51 }
0x100d   : > { %v2496_v57 = vmul.f32 %v2986_v48, %v2488_v55  ;;  %3173 = vmatprep.mubr.msk.f32.mxu1 %vm826_vm1, %v2503_v56 }
0x100f   : > { %v2504_v7 = vadd.f32 %v2987_v50, %v2496_v57 }
0x1011   : > { %3174 = vmatmul.mubr.msk.f32.vlgmr.msra.gmra.mrb[20].mxu1 %vm826_vm1, %v2504_v7 }
0x10e4   : > { %v3175_v10 = vpop.f32.mrb[20].mxu1 }
0x10e5   : > { %v2594_v12 = vadd.f32 %v3175_v10, %v2988_v9  ;;  %v2588_v13 = vpop.f32.mrb[21].mxu1 }
0x10e6   : > { %v2589_v14 = vadd.f32 %v2988_v9, %v2588_v13 }
0x10e7   : > { %v2601_v15 = vmul.f32 0.70710677, %v2594_v12  ;;  %v2598_v52 = vmul.f32 0.5, %v2594_v12 }
0x10e8   : > { %v2600_v17 = vmul.f32 0.70710677, %v2589_v14  ;;  %v2597_v21 = vmul.f32 0.5, %v2589_v14 }
0x10e9   : > { %3360 = verf.f32 %v2601_v15 }
0x10ea   : > { %3362 = verf.f32 %v2600_v17 }
0x10f3   : > { %v3361_v18 = vpop.eup %3360 }
0x10f4   : > { %v3363_v19 = vpop.eup %3362  ;;  %v2605_v20 = vadd.f32 1.0, %v3361_v18 }
0x10f5   : > { %v2604_v22 = vadd.f32 1.0, %v3363_v19 }
0x10f6   : > { %v2607_v24 = vmul.f32 %v2605_v20, %v2598_v52 }
0x10f7   : > { %v2606_v23 = vmul.f32 %v2604_v22, %v2597_v21 }
0x10f9   : > { %3192 = vmatprep.mubr.msk.f32.mxu0 %vm2623_vm6, %v2606_v23 }
0x10fa   : > { %3193 = vmatmul.mubr.msk.f32.vlgmr.msra.gmra.mrb[16].mxu0 %vm2623_vm6, %v2607_v24 }
0x11cd   : > { %v3194_v54 = vpop.f32.mrb[16].mxu0  ;;  %2712 = sbr.rel (%p2994_p6) target bundleno = 4564 (0x11d4), region = 104 }
0x11ce   : > { %v2702_v28 = vadd.f32 %v3194_v54, %v2991_v25  ;;  %v2696_v29 = vpop.f32.mrb[17].mxu0 }
0x11cf   : > { %v2697_v32 = vadd.f32 %v2991_v25, %v2696_v29 }
0x11d0   : > { %v2706_v31 = vadd.f32 %v2702_v28, %v4001_v26 }
0x11d1   : > { %v2705_v30 = vadd.f32 %v2697_v32, %v4003_v27 }
0x11d2   : > { %2708 = vst.msk [vmem:[#allocation2 + $0x8] sm:$0xff] %vm826_vm1, %v2706_v31  ;;  %2714 = vst.msk [vmem:[#allocation9 + $0x8] sm:$0xff] (!%p2994_p6), %vm826_vm1, %v2706_v31 }
0x11d3   : > { %2707 = vst.msk [vmem:[#allocation2] sm:$0xff] %vm826_vm1, %v2705_v30  ;;  %2713 = vst.msk [vmem:[#allocation9] sm:$0xff] (!%p2994_p6), %vm826_vm1, %v2705_v30 }
0x11d4 PF: > { %s4152_s2 = sld [smem:[#allocation14_spill]]  ;;  %s3531_s14 = smov [#allocation9]  }
0x11d5   : > { %s2724_s30 = sshll.u32 %s3531_s14, 4  ;;  %s2725_s30 = int_to_ptr.vmem [resolvable:$true] %s2724_s30 }
0x11d6   : > { %s3448_s6 = scalar_lea.vmem %s2725_s30, 256  ;;  %p3455_p13 = scmp.lt.s32.totalorder %s2725_s30, %s2725_s30 }
0x11d7   : > { %p3449_p10 = scmp.ne.s32.totalorder %s2725_s30, %s3448_s6  ;;  %p3456_p0 = scmp.lt.s32.totalorder %s3448_s6, %s3448_s6 }
0x11d9   : > { %p3457_p1 = por %p3456_p0, %p3455_p13 }
0x11da   : > { %s4153_s20 = sadd.s32 4294967295, %s4152_s2  }
0x11db   : > { %p4056_p9 = scmp.eq.s32.totalorder %s4153_s20, 1 }
0x11dd   : > { %p3450_p11 = pnand %p3449_p10, %p4056_p9 }
0x11df   : > { %p3451_p12 = pneg %p3450_p11 }
0x11e1   : > { %p3458_p4 = pnand %p3457_p1, %p3451_p12 }
0x11e3   : > { %3461 = shalt.err (!%p3458_p4)
}
0x11e4   : > { %s4155_s0 = sld [smem:[#allocation24_spill]] }
0x11ea   : > { %s3462_s26 = scalar_lea.hbm %s4155_s0, 256 }
0x11eb   : > { %p3463_p7 = scmp.ne.s32.totalorder %s4155_s0, %s3462_s26  ;;  %p3468_p8 = scmp.lt.u32.totalorder %s3462_s26, %s4155_s0 }
0x11ed   : > { %p3464_p2 = pnand %p3463_p7, %p4056_p9 }
0x11ef   : > { %p3465_p3 = pneg %p3464_p2 }
0x11f1   : > { %p3470_p5 = pnand %p3468_p8, %p3465_p3 }
0x11f3   : > { %3473 = shalt.err (!%p3470_p5)
}
0x11f4   : > { %s3532_s19 = smov 128  }
0x11f5   : > { %3248 = dma.vmem_to_hbm [thread:$0]  (%p4056_p9), %s2725_s30, 256, %s4155_s0, [#allocation5], %s3532_s19, %s3532_s19, %s3528_s16  }
0x11f6   : > { %3495 = dma.done.wait (%p4056_p9), [#allocation5], 256  }
0x11f7   : > { %3497 = vsyncadd (%p4056_p9), [#allocation5], 4294967040 }
0x11f8 PF: > { %s4156_s3 = sld [smem:[#allocation14_spill]]  ;;  %s4157_s21 = sld [smem:[#allocation13_spill]] }
0x11f9   : > { %s4158_s22 = sld [smem:[#allocation15_spill]] }
0x11fe   : > { %s29_s23 = sadd.s32 1, %s4156_s3  }
0x11ff   : > { %p26_p6 = scmp.ge.s32.totalorder %s29_s23, 4  }
0x1201   :  { %28 = sbr.rel (!%p26_p6) target bundleno = 14 (0xe), region = 170 }
0x1208   :  { %2740 = vsyncpa [#allocation4], 1 }
0x1209   :  { %2742 = vsyncpa [#allocation4 + $0x1], 1 }
0x120a   :  { %2743 = vsyncpa [#allocation7], 1 }
0x120b   :  { %2744 = vsyncpa [#allocation5], 1 }
0x120c   :  { %2746 = vsyncpa [#allocation5 + $0x1], 1 }

</bundles_post_ra>
